<compile_context>
chip_gen: v7x
topology: tpu7x:2x2x1
jax: 0.10.0
libtpu: 0.0.40
codegen_flags: <defaults>
</compile_context>

<pallas_src>
import jax
import jax.numpy as jnp
import numpy as np
from jax.experimental import pallas as pl
from jax.experimental.pallas import tpu as pltpu


NUM_FEATURE = 24
NUM_Z = 100
NUM_OUT = 1
H0 = 1024
H1 = 512

NZ_PAD = 128     # NUM_Z padded to one full lane group
NOUT_PAD = 128   # output padded to one full lane group (lane-dense stores)


def _round_up(n, m):
    return (n + m - 1) // m * m


def _leaky_relu(x, slope=0.2):
    # max(x, slope*x) == LeakyReLU for 0 < slope < 1; 2 VALU ops vs cmp+sel+mul.
    return jnp.maximum(x, slope * x)


def _tpu_tuning():
    """Pick (block_m, vmem_limit_bytes, min_tiles) per TPU generation.

    Falls back to the v7x-safe configuration (64 MiB per-TC VMEM, 2 TCs) if
    the hardware query is unavailable — that config is correct everywhere.
    """
    vmem = None
    try:
        vmem = getattr(pltpu.get_tpu_info(), "vmem_capacity_bytes", None)
    except Exception:
        vmem = None
    if vmem is not None and vmem >= 96 * 1024 * 1024:
        # v5e / v6e: 128 MiB VMEM, single TensorCore -> biggest tile wins.
        return 2048, 64 * 1024 * 1024, 1
    # v7x-safe: smaller tile, moderate scoped VMEM, keep >= 2 grid steps so
    # both TensorCores get batch tiles (harmless ~0.35 us on 1-TC chips).
    return 1024, 40 * 1024 * 1024, 2


def _choose_tile(batch, block_m, min_tiles):
    """Balanced batch tiles: minimizes padding waste (<= 15 rows per tile)."""
    n_tiles = max(pl.cdiv(batch, block_m), min_tiles)
    # Multiple of 16 sublane-rows: bf16 activations/outputs pack 2 rows/sublane.
    tm = _round_up(pl.cdiv(batch, n_tiles), 16)
    padded = _round_up(batch, tm)
    return tm, padded


def discriminator_kernel(
    x_ref, z_ref,
    w0_ref, b0_ref,
    w1_ref, b1_ref,
    w2_ref, b2_ref,
    w3a_ref, w3b_ref, b3_ref,
    out_ref,
):
    # hidden0: Linear(24, 1024) + LeakyReLU(0.2)   (Dropout = identity in eval)
    # f32 MXU accumulation; bias-add + LeakyReLU epilogue in bf16.
    h = jnp.dot(x_ref[...], w0_ref[...], preferred_element_type=jnp.float32)
    h = _leaky_relu(h.astype(jnp.bfloat16) + b0_ref[...])

    # hidden1: Linear(1024, 512) + LeakyReLU(0.2)
    h = jnp.dot(h, w1_ref[...], preferred_element_type=jnp.float32)
    h = _leaky_relu(h.astype(jnp.bfloat16) + b1_ref[...])

    # hidden2: Linear(512, 128-padded) + LeakyReLU(0.2)  (cols 100..127 exact zeros)
    h = jnp.dot(h, w2_ref[...], preferred_element_type=jnp.float32)
    h = _leaky_relu(h.astype(jnp.bfloat16) + b2_ref[...])

    # out: cat([h, auto_latent], 1) -> Linear(200, 1) -> Sigmoid
    # implemented as a split matmul (mathematically identical to the concat);
    # output columns 1..127 are padding and are sliced off in the wrapper.
    logits = (
        jnp.dot(h, w3a_ref[...], preferred_element_type=jnp.float32)
        + jnp.dot(z_ref[...], w3b_ref[...], preferred_element_type=jnp.float32)
        + b3_ref[...]
    )
    # sigmoid(x) = 0.5 + 0.5*tanh(0.5*x): single EUP op, saturates (no overflow).
    out_ref[...] = (0.5 + 0.5 * jnp.tanh(0.5 * logits)).astype(out_ref.dtype)


def init_params(key):
    """Deterministic init mimicking torch.nn.Linear default (U[-1/sqrt(fan_in), +])."""
    def linear(k, fan_in, fan_out):
        kw, kb = jax.random.split(k)
        bound = 1.0 / np.sqrt(fan_in)
        w = jax.random.uniform(kw, (fan_in, fan_out), jnp.float32, -bound, bound)
        b = jax.random.uniform(kb, (fan_out,), jnp.float32, -bound, bound)
        return w, b

    k0, k1, k2, k3 = jax.random.split(key, 4)
    w0, b0 = linear(k0, NUM_FEATURE, H0)
    w1, b1 = linear(k1, H0, H1)
    w2, b2 = linear(k2, H1, NUM_Z)
    w3, b3 = linear(k3, 2 * NUM_Z, NUM_OUT)
    return (w0, b0, w1, b1, w2, b2, w3, b3)


def prepare_params(params):
    """Pad NUM_Z->128 / NUM_OUT->128 with zeros, split W3, cast to kernel dtypes."""
    w0, b0, w1, b1, w2, b2, w3, b3 = params
    bf16 = jnp.bfloat16

    w2p = jnp.pad(w2, ((0, 0), (0, NZ_PAD - NUM_Z)))
    b2p = jnp.pad(b2, ((0, NZ_PAD - NUM_Z),))
    w3a = jnp.pad(w3[:NUM_Z, :], ((0, NZ_PAD - NUM_Z), (0, NOUT_PAD - NUM_OUT)))
    w3b = jnp.pad(w3[NUM_Z:, :], ((0, NZ_PAD - NUM_Z), (0, NOUT_PAD - NUM_OUT)))
    b3p = jnp.pad(b3, ((0, NOUT_PAD - NUM_OUT),))

    return (
        w0.astype(bf16), b0.reshape(1, H0).astype(bf16),      # bf16 epilogue biases
        w1.astype(bf16), b1.reshape(1, H1).astype(bf16),
        w2p.astype(bf16), b2p.reshape(1, NZ_PAD).astype(bf16),
        w3a.astype(bf16), w3b.astype(bf16),
        b3p.reshape(1, NOUT_PAD).astype(jnp.float32),          # logits stay f32
    )


def discriminator_forward(x, auto_latent, params, *, block_m=None, vmem_limit_bytes=None):
    batch = x.shape[0]
    kparams = prepare_params(params)

    auto_block_m, auto_vmem, min_tiles = _tpu_tuning()
    if block_m is None:
        block_m = auto_block_m
    if vmem_limit_bytes is None:
        vmem_limit_bytes = auto_vmem

    tm, padded = _choose_tile(batch, block_m, min_tiles)
    grid = (padded // tm,)

    xb = jnp.pad(x, ((0, padded - batch), (0, 0))).astype(jnp.bfloat16)
    zb = jnp.pad(
        auto_latent, ((0, padded - batch), (0, NZ_PAD - NUM_Z))
    ).astype(jnp.bfloat16)

    def row_spec(shape):    # tiled over the batch axis
        return pl.BlockSpec(shape, lambda i: (i, 0))

    def const_spec(shape):  # constant index_map: weights stay resident in VMEM
        return pl.BlockSpec(shape, lambda i: (0, 0))

    in_specs = [
        row_spec((tm, NUM_FEATURE)),           # x tile
        row_spec((tm, NZ_PAD)),                # auto_latent tile
        const_spec((NUM_FEATURE, H0)), const_spec((1, H0)),
        const_spec((H0, H1)),          const_spec((1, H1)),
        const_spec((H1, NZ_PAD)),      const_spec((1, NZ_PAD)),
        const_spec((NZ_PAD, NOUT_PAD)), const_spec((NZ_PAD, NOUT_PAD)),
        const_spec((1, NOUT_PAD)),
    ]
    out_specs = row_spec((tm, NOUT_PAD))

    flops = 2 * padded * (
        NUM_FEATURE * H0 + H0 * H1 + H1 * NZ_PAD + 2 * NZ_PAD * NOUT_PAD
    )
    weight_bytes = 2 * (NUM_FEATURE * H0 + H0 * H1 + H1 * NZ_PAD + 2 * NZ_PAD * NOUT_PAD)
    bias_bytes = 2 * (H0 + H1 + NZ_PAD) + 4 * NOUT_PAD
    io_bytes = padded * (2 * NUM_FEATURE + 2 * NZ_PAD + 2 * NOUT_PAD)

    out = pl.pallas_call(
        discriminator_kernel,
        out_shape=jax.ShapeDtypeStruct((padded, NOUT_PAD), jnp.bfloat16),
        grid=grid,
        in_specs=in_specs,
        out_specs=out_specs,
        compiler_params=pltpu.CompilerParams(
            dimension_semantics=("parallel",),      # shard batch tiles across TCs (v7x)
            vmem_limit_bytes=vmem_limit_bytes,
        ),
        cost_estimate=pl.CostEstimate(
            flops=flops,
            transcendentals=padded * NOUT_PAD,
            bytes_accessed=weight_bytes + bias_bytes + io_bytes,
        ),
    )(xb, zb, *kparams)

    # strip batch padding + the 128-lane padding of the single-logit output
    return out[:batch, :NUM_OUT].astype(jnp.float32)


def reference_forward(x, auto_latent, params):
    """Exact f32 reference matching the PyTorch module (eval mode)."""
    w0, b0, w1, b1, w2, b2, w3, b3 = params

    def lrelu(v):
        return jnp.where(v > 0, v, 0.2 * v)

    h = lrelu(x @ w0 + b0)
    h = lrelu(h @ w1 + b1)
    h = lrelu(h @ w2 + b2)
    logits = jnp.concatenate([h, auto_latent], axis=1) @ w3 + b3
    return jax.nn.sigmoid(logits)


if __name__ == "__main__":
    key = jax.random.PRNGKey(0)
    kp, kx, kz = jax.random.split(key, 3)

    params = init_params(kp)

    batch = 2
    x = jax.random.normal(kx, (batch, NUM_FEATURE), jnp.float32)
    auto_latent = jax.random.normal(kz, (batch, NUM_Z), jnp.float32)

    out = discriminator_forward(x, auto_latent, params)
    out = jax.block_until_ready(out)

    ref = reference_forward(x, auto_latent, params)
    assert out.shape == (batch, NUM_OUT)
    # bf16 MXU operands / bf16 epilogue / bf16 output -> loosened tolerance vs f32 ref.
    assert jnp.allclose(out, ref, atol=3e-2, rtol=3e-2), (out, ref)

    print("KERNEL_OK")
</pallas_src>

<mosaic_0001>
module attributes {stable_mosaic.version = 11 : i64} {
  func.func @discriminator_kernel(%arg0: i32, %arg1: memref<16x24xbf16, #tpu.memory_space<vmem>>, %arg2: memref<16x128xbf16, #tpu.memory_space<vmem>>, %arg3: memref<24x1024xbf16, #tpu.memory_space<vmem>>, %arg4: memref<1x1024xbf16, #tpu.memory_space<vmem>>, %arg5: memref<1024x512xbf16, #tpu.memory_space<vmem>>, %arg6: memref<1x512xbf16, #tpu.memory_space<vmem>>, %arg7: memref<512x128xbf16, #tpu.memory_space<vmem>>, %arg8: memref<1x128xbf16, #tpu.memory_space<vmem>>, %arg9: memref<128x128xbf16, #tpu.memory_space<vmem>>, %arg10: memref<128x128xbf16, #tpu.memory_space<vmem>>, %arg11: memref<1x128xf32, #tpu.memory_space<vmem>>, %arg12: memref<16x128xbf16, #tpu.memory_space<vmem>>) attributes {dimension_semantics = [#tpu.dimension_semantics<parallel>], iteration_bounds = array<i64: 1>, scalar_prefetch = 0 : i64, scratch_operands = 0 : i64, tpu.core_type = #tpu.core_type<tc>, window_params = [{transform_indices = @transform_0, window_bounds = array<i64: 16, 24>}, {transform_indices = @transform_1, window_bounds = array<i64: 16, 128>}, {pipeline_mode = #tpu.pipeline_mode<synchronous>, transform_indices = @transform_2, window_bounds = array<i64: 24, 1024>}, {pipeline_mode = #tpu.pipeline_mode<synchronous>, transform_indices = @transform_3, window_bounds = array<i64: 1, 1024>}, {pipeline_mode = #tpu.pipeline_mode<synchronous>, transform_indices = @transform_4, window_bounds = array<i64: 1024, 512>}, {pipeline_mode = #tpu.pipeline_mode<synchronous>, transform_indices = @transform_5, window_bounds = array<i64: 1, 512>}, {pipeline_mode = #tpu.pipeline_mode<synchronous>, transform_indices = @transform_6, window_bounds = array<i64: 512, 128>}, {pipeline_mode = #tpu.pipeline_mode<synchronous>, transform_indices = @transform_7, window_bounds = array<i64: 1, 128>}, {pipeline_mode = #tpu.pipeline_mode<synchronous>, transform_indices = @transform_8, window_bounds = array<i64: 128, 128>}, {pipeline_mode = #tpu.pipeline_mode<synchronous>, transform_indices = @transform_9, window_bounds = array<i64: 128, 128>}, {pipeline_mode = #tpu.pipeline_mode<synchronous>, transform_indices = @transform_10, window_bounds = array<i64: 1, 128>}, {transform_indices = @transform_11, window_bounds = array<i64: 16, 128>}]} {
    %c0 = arith.constant 0 : index
    %c0_0 = arith.constant 0 : index
    %0 = vector.load %arg1[%c0, %c0_0] : memref<16x24xbf16, #tpu.memory_space<vmem>>, vector<16x24xbf16>
    %c0_1 = arith.constant 0 : index
    %c0_2 = arith.constant 0 : index
    %1 = vector.load %arg3[%c0_1, %c0_2] : memref<24x1024xbf16, #tpu.memory_space<vmem>>, vector<24x1024xbf16>
    %cst = arith.constant dense<0.000000e+00> : vector<16x1024xf32>
    %2 = tpu.matmul %0, %1, %cst {dimension_numbers = #tpu.dot_dimension_numbers<[1], [0], [0], [1], [0, 0, 1, 1], [], []>} : vector<16x24xbf16>, vector<24x1024xbf16>, vector<16x1024xf32> -> vector<16x1024xf32>
    %3 = arith.truncf %2 : vector<16x1024xf32> to vector<16x1024xbf16>
    %c0_3 = arith.constant 0 : index
    %c0_4 = arith.constant 0 : index
    %4 = vector.load %arg4[%c0_3, %c0_4] : memref<1x1024xbf16, #tpu.memory_space<vmem>>, vector<1x1024xbf16>
    %5 = vector.broadcast %4 : vector<1x1024xbf16> to vector<16x1024xbf16>
    %6 = arith.addf %3, %5 : vector<16x1024xbf16>
    %cst_5 = arith.constant 2.001950e-01 : bf16
    %7 = vector.broadcast %cst_5 : bf16 to vector<16x1024xbf16>
    %8 = arith.mulf %7, %6 : vector<16x1024xbf16>
    %9 = arith.maximumf %6, %8 : vector<16x1024xbf16>
    %c0_6 = arith.constant 0 : index
    %c0_7 = arith.constant 0 : index
    %10 = vector.load %arg5[%c0_6, %c0_7] : memref<1024x512xbf16, #tpu.memory_space<vmem>>, vector<1024x512xbf16>
    %cst_8 = arith.constant dense<0.000000e+00> : vector<16x512xf32>
    %11 = tpu.matmul %9, %10, %cst_8 {dimension_numbers = #tpu.dot_dimension_numbers<[1], [0], [0], [1], [0, 0, 1, 1], [], []>} : vector<16x1024xbf16>, vector<1024x512xbf16>, vector<16x512xf32> -> vector<16x512xf32>
    %12 = arith.truncf %11 : vector<16x512xf32> to vector<16x512xbf16>
    %c0_9 = arith.constant 0 : index
    %c0_10 = arith.constant 0 : index
    %13 = vector.load %arg6[%c0_9, %c0_10] : memref<1x512xbf16, #tpu.memory_space<vmem>>, vector<1x512xbf16>
    %14 = vector.broadcast %13 : vector<1x512xbf16> to vector<16x512xbf16>
    %15 = arith.addf %12, %14 : vector<16x512xbf16>
    %cst_11 = arith.constant 2.001950e-01 : bf16
    %16 = vector.broadcast %cst_11 : bf16 to vector<16x512xbf16>
    %17 = arith.mulf %16, %15 : vector<16x512xbf16>
    %18 = arith.maximumf %15, %17 : vector<16x512xbf16>
    %c0_12 = arith.constant 0 : index
    %c0_13 = arith.constant 0 : index
    %19 = vector.load %arg7[%c0_12, %c0_13] : memref<512x128xbf16, #tpu.memory_space<vmem>>, vector<512x128xbf16>
    %cst_14 = arith.constant dense<0.000000e+00> : vector<16x128xf32>
    %20 = tpu.matmul %18, %19, %cst_14 {dimension_numbers = #tpu.dot_dimension_numbers<[1], [0], [0], [1], [0, 0, 1, 1], [], []>} : vector<16x512xbf16>, vector<512x128xbf16>, vector<16x128xf32> -> vector<16x128xf32>
    %21 = arith.truncf %20 : vector<16x128xf32> to vector<16x128xbf16>
    %c0_15 = arith.constant 0 : index
    %c0_16 = arith.constant 0 : index
    %22 = vector.load %arg8[%c0_15, %c0_16] : memref<1x128xbf16, #tpu.memory_space<vmem>>, vector<1x128xbf16>
    %23 = vector.broadcast %22 : vector<1x128xbf16> to vector<16x128xbf16>
    %24 = arith.addf %21, %23 : vector<16x128xbf16>
    %cst_17 = arith.constant 2.001950e-01 : bf16
    %25 = vector.broadcast %cst_17 : bf16 to vector<16x128xbf16>
    %26 = arith.mulf %25, %24 : vector<16x128xbf16>
    %27 = arith.maximumf %24, %26 : vector<16x128xbf16>
    %c0_18 = arith.constant 0 : index
    %c0_19 = arith.constant 0 : index
    %28 = vector.load %arg9[%c0_18, %c0_19] : memref<128x128xbf16, #tpu.memory_space<vmem>>, vector<128x128xbf16>
    %cst_20 = arith.constant dense<0.000000e+00> : vector<16x128xf32>
    %29 = tpu.matmul %27, %28, %cst_20 {dimension_numbers = #tpu.dot_dimension_numbers<[1], [0], [0], [1], [0, 0, 1, 1], [], []>} : vector<16x128xbf16>, vector<128x128xbf16>, vector<16x128xf32> -> vector<16x128xf32>
    %c0_21 = arith.constant 0 : index
    %c0_22 = arith.constant 0 : index
    %30 = vector.load %arg2[%c0_21, %c0_22] : memref<16x128xbf16, #tpu.memory_space<vmem>>, vector<16x128xbf16>
    %c0_23 = arith.constant 0 : index
    %c0_24 = arith.constant 0 : index
    %31 = vector.load %arg10[%c0_23, %c0_24] : memref<128x128xbf16, #tpu.memory_space<vmem>>, vector<128x128xbf16>
    %cst_25 = arith.constant dense<0.000000e+00> : vector<16x128xf32>
    %32 = tpu.matmul %30, %31, %cst_25 {dimension_numbers = #tpu.dot_dimension_numbers<[1], [0], [0], [1], [0, 0, 1, 1], [], []>} : vector<16x128xbf16>, vector<128x128xbf16>, vector<16x128xf32> -> vector<16x128xf32>
    %33 = arith.addf %29, %32 : vector<16x128xf32>
    %c0_26 = arith.constant 0 : index
    %c0_27 = arith.constant 0 : index
    %34 = vector.load %arg11[%c0_26, %c0_27] : memref<1x128xf32, #tpu.memory_space<vmem>>, vector<1x128xf32>
    %35 = vector.broadcast %34 : vector<1x128xf32> to vector<16x128xf32>
    %36 = arith.addf %33, %35 : vector<16x128xf32>
    %cst_28 = arith.constant 5.000000e-01 : f32
    %37 = vector.broadcast %cst_28 : f32 to vector<16x128xf32>
    %38 = arith.mulf %37, %36 : vector<16x128xf32>
    %39 = math.tanh %38 : vector<16x128xf32>
    %cst_29 = arith.constant 5.000000e-01 : f32
    %40 = vector.broadcast %cst_29 : f32 to vector<16x128xf32>
    %41 = arith.mulf %40, %39 : vector<16x128xf32>
    %cst_30 = arith.constant 5.000000e-01 : f32
    %42 = vector.broadcast %cst_30 : f32 to vector<16x128xf32>
    %43 = arith.addf %42, %41 : vector<16x128xf32>
    %44 = arith.truncf %43 : vector<16x128xf32> to vector<16x128xbf16>
    %c0_31 = arith.constant 0 : index
    %c0_32 = arith.constant 0 : index
    %45 = vector.load %arg12[%c0_31, %c0_32] : memref<16x128xbf16, #tpu.memory_space<vmem>>, vector<16x128xbf16>
    tpu.vector_store %arg12[%c0_31, %c0_32], %44 {strides = array<i32>} : memref<16x128xbf16, #tpu.memory_space<vmem>>, vector<16x128xbf16>,
    return
  }
  func.func @transform_0(%arg0: i32) -> (i32, i32) {
    %c0_i32 = arith.constant 0 : i32
    %c0_i32_0 = arith.constant 0 : i32
    return %arg0, %c0_i32 : i32, i32
  }
  func.func @transform_1(%arg0: i32) -> (i32, i32) {
    %c0_i32 = arith.constant 0 : i32
    %c0_i32_0 = arith.constant 0 : i32
    return %arg0, %c0_i32 : i32, i32
  }
  func.func @transform_2(%arg0: i32) -> (i32, i32) {
    %c0_i32 = arith.constant 0 : i32
    %c0_i32_0 = arith.constant 0 : i32
    %c0_i32_1 = arith.constant 0 : i32
    return %c0_i32, %c0_i32_0 : i32, i32
  }
  func.func @transform_3(%arg0: i32) -> (i32, i32) {
    %c0_i32 = arith.constant 0 : i32
    %c0_i32_0 = arith.constant 0 : i32
    %c0_i32_1 = arith.constant 0 : i32
    return %c0_i32, %c0_i32_0 : i32, i32
  }
  func.func @transform_4(%arg0: i32) -> (i32, i32) {
    %c0_i32 = arith.constant 0 : i32
    %c0_i32_0 = arith.constant 0 : i32
    %c0_i32_1 = arith.constant 0 : i32
    return %c0_i32, %c0_i32_0 : i32, i32
  }
  func.func @transform_5(%arg0: i32) -> (i32, i32) {
    %c0_i32 = arith.constant 0 : i32
    %c0_i32_0 = arith.constant 0 : i32
    %c0_i32_1 = arith.constant 0 : i32
    return %c0_i32, %c0_i32_0 : i32, i32
  }
  func.func @transform_6(%arg0: i32) -> (i32, i32) {
    %c0_i32 = arith.constant 0 : i32
    %c0_i32_0 = arith.constant 0 : i32
    %c0_i32_1 = arith.constant 0 : i32
    return %c0_i32, %c0_i32_0 : i32, i32
  }
  func.func @transform_7(%arg0: i32) -> (i32, i32) {
    %c0_i32 = arith.constant 0 : i32
    %c0_i32_0 = arith.constant 0 : i32
    %c0_i32_1 = arith.constant 0 : i32
    return %c0_i32, %c0_i32_0 : i32, i32
  }
  func.func @transform_8(%arg0: i32) -> (i32, i32) {
    %c0_i32 = arith.constant 0 : i32
    %c0_i32_0 = arith.constant 0 : i32
    %c0_i32_1 = arith.constant 0 : i32
    return %c0_i32, %c0_i32_0 : i32, i32
  }
  func.func @transform_9(%arg0: i32) -> (i32, i32) {
    %c0_i32 = arith.constant 0 : i32
    %c0_i32_0 = arith.constant 0 : i32
    %c0_i32_1 = arith.constant 0 : i32
    return %c0_i32, %c0_i32_0 : i32, i32
  }
  func.func @transform_10(%arg0: i32) -> (i32, i32) {
    %c0_i32 = arith.constant 0 : i32
    %c0_i32_0 = arith.constant 0 : i32
    %c0_i32_1 = arith.constant 0 : i32
    return %c0_i32, %c0_i32_0 : i32, i32
  }
  func.func @transform_11(%arg0: i32) -> (i32, i32) {
    %c0_i32 = arith.constant 0 : i32
    %c0_i32_0 = arith.constant 0 : i32
    return %arg0, %c0_i32 : i32, i32
  }
}

</mosaic_0001>

<bundles_post_ra>
// kernel: tpu_custom_call.1
= control target key start
LH: loop header
LB: loop body
LE: loop exit
PB: predicated region body
PF: predicated region fallthrough
CT: control target
= control target key end

     0   :  { %16 = vsyncpa [#allocation3], 0  ;;  %s4569_s0 = inlined_call_operand.hbm [shape: bf16[16,24], index: 0, kind: input, shape index: {}]   ;;  %s4570_s1 = inlined_call_operand.hbm [shape: bf16[16,128], index: 1, kind: input, shape index: {}]   ;;  %s4571_s2 = inlined_call_operand.hbm [shape: bf16[24,1024], index: 2, kind: input, shape index: {}]   ;;  %s4572_s3 = inlined_call_operand.vmem [shape: bf16[1,1024], index: 3, kind: input, shape index: {}]   ;;  %s4573_s4 = inlined_call_operand.hbm [shape: bf16[1024,512], index: 4, kind: input, shape index: {}]   ;;  %s4574_s5 = inlined_call_operand.vmem [shape: bf16[1,512], index: 5, kind: input, shape index: {}]   ;;  %s4575_s6 = inlined_call_operand.hbm [shape: bf16[512,128], index: 6, kind: input, shape index: {}]   ;;  %s4576_s7 = inlined_call_operand.vmem [shape: bf16[1,128], index: 7, kind: input, shape index: {}]   ;;  %s4577_s8 = inlined_call_operand.hbm [shape: bf16[128,128], index: 8, kind: input, shape index: {}]   ;;  %s4578_s9 = inlined_call_operand.hbm [shape: bf16[128,128], index: 9, kind: input, shape index: {}]   ;;  %s4579_s10 = inlined_call_operand.vmem [shape: f32[1,128], index: 10, kind: input, shape index: {}]   ;;  %s4580_s11 = inlined_call_operand.hbm [shape: bf16[16,128], index: 11, kind: output, shape index: {}]  }
   0x1   :  { %17 = vsyncpa [#allocation6], 0 }
   0x2   :  { %18 = vsyncpa [#allocation9], 0 }
   0x3   :  { %19 = vsyncpa [#allocation12], 0 }
   0x4   :  { %20 = vsyncpa [#allocation4], 0  ;;  %s4238_s17 = smov [#allocation5]   ;;  %s4239_s19 = smov [#allocation8]  }
   0x5   :  { %s38_s18 = sshll.u32 %s4238_s17, 4  ;;  %s64_s20 = sshll.u32 %s4239_s19, 4  ;;  %s39_s18 = int_to_ptr.vmem [resolvable:$true] %s38_s18  ;;  %s4316_s20 = int_to_ptr.vmem [resolvable:$true] %s64_s20 }
   0x6   :  { %s4052_s23 = scalar_lea.hbm %s4570_s1, 128 }
   0x7   :  { %p4053_p0 = scmp.ne.s32.totalorder %s4570_s1, %s4052_s23  ;;  %p4056_p1 = scmp.lt.u32.totalorder %s4052_s23, %s4570_s1 }
   0x9   :  { %p4058_p2 = pnand %p4056_p1, %p4053_p0 }
   0xb   :  { %4061 = shalt.err (!%p4058_p2)
}
   0xc   :  { %s4062_s28 = scalar_lea.vmem %s39_s18, 128  ;;  %p4067_p4 = scmp.lt.s32.totalorder %s39_s18, %s39_s18 }
   0xd   :  { %p4063_p3 = scmp.ne.s32.totalorder %s39_s18, %s4062_s28  ;;  %p4068_p5 = scmp.lt.s32.totalorder %s4062_s28, %s4062_s28 }
   0xf   :  { %p4069_p6 = por %p4068_p5, %p4067_p4 }
  0x11   :  { %p4070_p7 = pnand %p4069_p6, %p4063_p3 }
  0x13   :  { %4073 = shalt.err (!%p4070_p7)
}
  0x14   :  { %s4240_s29 = smov 64   ;;  %s4241_s30 = smov 4  }
  0x15   :  { %44 = dma.hbm_to_vmem [thread:$0]  %s4570_s1, 128, %s39_s18, [#allocation6], %s4240_s29, %s4240_s29, %s4241_s30  }
  0x16   :  { %s4074_s16 = scalar_lea.hbm %s4573_s4, 32768 }
  0x17   :  { %p4075_p8 = scmp.ne.s32.totalorder %s4573_s4, %s4074_s16  ;;  %p4078_p9 = scmp.lt.u32.totalorder %s4074_s16, %s4573_s4 }
  0x19   :  { %p4080_p10 = pnand %p4078_p9, %p4075_p8 }
  0x1b   :  { %4083 = shalt.err (!%p4080_p10)
}
  0x1c   :  { %s4084_s23 = scalar_lea.vmem %s4316_s20, 32768  ;;  %p4089_p12 = scmp.lt.s32.totalorder %s4316_s20, %s4316_s20 }
  0x1d   :  { %p4085_p11 = scmp.ne.s32.totalorder %s4316_s20, %s4084_s23  ;;  %p4090_p13 = scmp.lt.s32.totalorder %s4084_s23, %s4084_s23 }
  0x1f   :  { %p4091_p0 = por %p4090_p13, %p4089_p12 }
  0x21   :  { %p4092_p1 = pnand %p4091_p0, %p4085_p11 }
  0x23   :  { %4095 = shalt.err (!%p4092_p1)
}
  0x24   :  { %s4242_s1 = smov 256   ;;  %s4243_s18 = smov 16  }
  0x25   :  { %70 = dma.hbm_to_vmem [thread:$0]  %s4573_s4, 32768, %s4316_s20, [#allocation9], %s4242_s1, %s4242_s1, %s4243_s18  }
  0x26   :  { %s4244_s26 = smov [#allocation11]   ;;  %s4245_s28 = smov [#allocation2]  }
  0x27   :  { %s92_s27 = sshll.u32 %s4244_s26, 4  ;;  %s26_s12 = sshll.u32 %s4245_s28, 4  ;;  %s93_s27 = int_to_ptr.vmem [resolvable:$true] %s92_s27  ;;  %s4350_s12 = int_to_ptr.vmem [resolvable:$true] %s26_s12 }
  0x28   :  { %s4096_s15 = scalar_lea.hbm %s4577_s8, 1024 }
  0x29   :  { %p4097_p2 = scmp.ne.s32.totalorder %s4577_s8, %s4096_s15  ;;  %p4100_p3 = scmp.lt.u32.totalorder %s4096_s15, %s4577_s8 }
  0x2b   :  { %p4102_p4 = pnand %p4100_p3, %p4097_p2 }
  0x2d   :  { %4105 = shalt.err (!%p4102_p4)
}
  0x2e   :  { %s4106_s4 = scalar_lea.vmem %s93_s27, 1024  ;;  %p4111_p6 = scmp.lt.s32.totalorder %s93_s27, %s93_s27 }
  0x2f   :  { %p4107_p5 = scmp.ne.s32.totalorder %s93_s27, %s4106_s4  ;;  %p4112_p7 = scmp.lt.s32.totalorder %s4106_s4, %s4106_s4 }
  0x31   :  { %p4113_p8 = por %p4112_p7, %p4111_p6 }
  0x33   :  { %p4114_p9 = pnand %p4113_p8, %p4107_p5 }
  0x35   :  { %4117 = shalt.err (!%p4114_p9)
}
  0x36   :  { %98 = dma.hbm_to_vmem [thread:$0]  %s4577_s8, 1024, %s93_s27, [#allocation12], %s4240_s29, %s4240_s29, %s4241_s30  }
  0x37   :  { %s4118_s18 = scalar_lea.hbm %s4569_s0, 128 }
  0x38   :  { %p4119_p10 = scmp.ne.s32.totalorder %s4569_s0, %s4118_s18  ;;  %p4122_p11 = scmp.lt.u32.totalorder %s4118_s18, %s4569_s0 }
  0x3a   :  { %p4124_p12 = pnand %p4122_p11, %p4119_p10 }
  0x3c   :  { %4127 = shalt.err (!%p4124_p12)
}
  0x3d   :  { %s4128_s13 = scalar_lea.vmem %s4350_s12, 128  ;;  %p4133_p0 = scmp.lt.s32.totalorder %s4350_s12, %s4350_s12 }
  0x3e   :  { %p4129_p13 = scmp.ne.s32.totalorder %s4350_s12, %s4128_s13  ;;  %p4134_p1 = scmp.lt.s32.totalorder %s4128_s13, %s4128_s13 }
  0x40   :  { %p4135_p2 = por %p4134_p1, %p4133_p0 }
  0x42   :  { %p4136_p3 = pnand %p4135_p2, %p4129_p13 }
  0x44   :  { %4139 = shalt.err (!%p4136_p3)
}
  0x45   :  { %32 = dma.hbm_to_vmem [thread:$0]  %s4569_s0, 128, %s4350_s12, [#allocation3], %s4240_s29, %s4240_s29, %s4241_s30  }
  0x46   :  { %s4246_s14 = smov [#allocation7]   ;;  %s4140_s19 = scalar_lea.hbm %s4571_s2, 1536 }
  0x47   :  { %s50_s15 = sshll.u32 %s4246_s14, 4  ;;  %p4141_p4 = scmp.ne.s32.totalorder %s4571_s2, %s4140_s19  ;;  %s51_s15 = int_to_ptr.vmem [resolvable:$true] %s50_s15 }
  0x48   :  { %p4144_p5 = scmp.lt.u32.totalorder %s4140_s19, %s4571_s2 }
  0x4a   :  { %p4146_p6 = pnand %p4144_p5, %p4141_p4 }
  0x4c   :  { %4149 = shalt.err (!%p4146_p6)
}
  0x4d   :  { %s4150_s23 = scalar_lea.vmem %s51_s15, 1536  ;;  %p4155_p8 = scmp.lt.s32.totalorder %s51_s15, %s51_s15 }
  0x4e   :  { %p4151_p7 = scmp.ne.s32.totalorder %s51_s15, %s4150_s23  ;;  %p4156_p9 = scmp.lt.s32.totalorder %s4150_s23, %s4150_s23 }
  0x50   :  { %p4157_p10 = por %p4156_p9, %p4155_p8 }
  0x52   :  { %p4158_p11 = pnand %p4157_p10, %p4151_p7 }
  0x54   :  { %4161 = shalt.err (!%p4158_p11)
}
  0x55   :  { %s4247_s0 = smov 512   ;;  %s4248_s12 = smov 32  }
  0x56   :  { %56 = dma.hbm_to_vmem [thread:$0]  %s4571_s2, 1536, %s51_s15, [#allocation6], %s4247_s0, %s4247_s0, %s4248_s12  }
  0x57   :  { %s4249_s24 = smov [#allocation10]   ;;  %s4250_s26 = smov [#allocation13]  }
  0x58   :  { %s78_s25 = sshll.u32 %s4249_s24, 4  ;;  %s104_s28 = sshll.u32 %s4250_s26, 4  ;;  %s79_s25 = int_to_ptr.vmem [resolvable:$true] %s78_s25  ;;  %s105_s28 = int_to_ptr.vmem [resolvable:$true] %s104_s28 }
  0x59   :  { %s4162_s27 = scalar_lea.hbm %s4575_s6, 4096 }
  0x5a   :  { %p4163_p12 = scmp.ne.s32.totalorder %s4575_s6, %s4162_s27  ;;  %p4166_p13 = scmp.lt.u32.totalorder %s4162_s27, %s4575_s6 }
  0x5c   :  { %p4168_p0 = pnand %p4166_p13, %p4163_p12 }
  0x5e   :  { %4171 = shalt.err (!%p4168_p0)
}
  0x5f   :  { %s4172_s2 = scalar_lea.vmem %s79_s25, 4096  ;;  %p4177_p2 = scmp.lt.s32.totalorder %s79_s25, %s79_s25 }
  0x60   :  { %p4173_p1 = scmp.ne.s32.totalorder %s79_s25, %s4172_s2  ;;  %p4178_p3 = scmp.lt.s32.totalorder %s4172_s2, %s4172_s2 }
  0x62   :  { %p4179_p4 = por %p4178_p3, %p4177_p2 }
  0x64   :  { %p4180_p5 = pnand %p4179_p4, %p4173_p1 }
  0x66   :  { %4183 = shalt.err (!%p4180_p5)
}
  0x67   :  { %84 = dma.hbm_to_vmem [thread:$0]  %s4575_s6, 4096, %s79_s25, [#allocation9], %s4240_s29, %s4240_s29, %s4241_s30  }
  0x68   :  { %s4184_s22 = scalar_lea.hbm %s4578_s9, 1024 }
  0x69   :  { %p4185_p6 = scmp.ne.s32.totalorder %s4578_s9, %s4184_s22  ;;  %p4188_p7 = scmp.lt.u32.totalorder %s4184_s22, %s4578_s9 }
  0x6b   :  { %p4190_p8 = pnand %p4188_p7, %p4185_p6 }
  0x6d   :  { %4193 = shalt.err (!%p4190_p8)
}
  0x6e   :  { %s4194_s18 = scalar_lea.vmem %s105_s28, 1024  ;;  %p4199_p10 = scmp.lt.s32.totalorder %s105_s28, %s105_s28 }
  0x6f   :  { %p4195_p9 = scmp.ne.s32.totalorder %s105_s28, %s4194_s18  ;;  %p4200_p11 = scmp.lt.s32.totalorder %s4194_s18, %s4194_s18 }
  0x71   :  { %p4201_p12 = por %p4200_p11, %p4199_p10 }
  0x73   :  { %p4202_p13 = pnand %p4201_p12, %p4195_p9 }
  0x75   :  { %4205 = shalt.err (!%p4202_p13)
}
  0x76   :  { %110 = dma.hbm_to_vmem [thread:$0]  %s4578_s9, 1024, %s105_s28, [#allocation12], %s4240_s29, %s4240_s29, %s4241_s30  }
  0x77   :  { %4228 = dma.done.wait [#allocation3], 128  }
  0x78   :  { %4229 = vsyncadd [#allocation3], 4294967168 }
  0x79   :  { %4230 = dma.done.wait [#allocation6], 1664  }
  0x7a   :  { %4231 = vsyncadd [#allocation6], 4294965632 }
  0x7b   :  { %4232 = dma.done.wait [#allocation9], 36864  }
  0x7c   :  { %4233 = vsyncadd [#allocation9], 4294930432 }
  0x7d   :  { %4234 = dma.done.wait [#allocation12], 2048  }
  0x7e   :  { %4235 = vsyncadd [#allocation12], 4294965248  ;;  %v4251_v0 = vmov 0   ;;  %v138_v1 = vld [vmem:[#allocation7] sm:$0xff]  ;;  %vm219_vm0 = vcmask 1043456   ;;  %v139_v8 = vld [vmem:[#allocation7 + $0x8] sm:$0xff] }
  0x7f   :  { %276 = vmatprep.mubr.bf16.mxu0 %v4251_v0  ;;  %319 = vmatprep.mubr.bf16.mxu1 %v4251_v0  ;;  %v142_v2 = vld [vmem:[#allocation7 + $0x20] sm:$0xff]  ;;  %v143_v9 = vld [vmem:[#allocation7 + $0x28] sm:$0xff]  ;;  %v140_v14 = vld [vmem:[#allocation7 + $0x10] sm:$0xff]  ;;  %vm215_vm1 = vcmask 195584   ;;  %vm4254_vm2 = vmmov 0   ;;  %s4255_s8 = smov [#allocation14]  }
  0x80   :  { %v146_v3 = vld [vmem:[#allocation7 + $0x40] sm:$0xff]  ;;  %v3122_v4 = vcombine.high %v138_v1, %v142_v2  ;;  %v3121_v5 = vcombine.low %v138_v1, %v142_v2  ;;  %v147_v10 = vld [vmem:[#allocation7 + $0x48] sm:$0xff]  ;;  %v3124_v11 = vcombine.high %v139_v8, %v143_v9  ;;  %v3123_v12 = vcombine.low %v139_v8, %v143_v9  ;;  %v144_v15 = vld [vmem:[#allocation7 + $0x30] sm:$0xff]  ;;  %s3105_s27 = sshll.u32 %s4255_s8, 4  ;;  %s3106_s27 = int_to_ptr.vmem [resolvable:$true] %s3105_s27 }
  0x81   :  { %v3130_v6 = vcombine.high %v146_v3, %v146_v3  ;;  %v3129_v7 = vcombine.low %v146_v3, %v146_v3  ;;  %v3132_v13 = vcombine.high %v147_v10, %v147_v10  ;;  %v3131_v16 = vcombine.low %v147_v10, %v147_v10  ;;  %v141_v17 = vld [vmem:[#allocation7 + $0x18] sm:$0xff]  ;;  %v148_v21 = vld [vmem:[#allocation7 + $0x50] sm:$0xff]  ;;  %p4211_p1 = scmp.lt.s32.totalorder %s3106_s27, %s3106_s27 }
  0x82   :  { %244 = vmatprep.subr.bf16.mxu0 %v3122_v4  ;;  %v145_v18 = vld [vmem:[#allocation7 + $0x38] sm:$0xff]  ;;  %287 = vmatprep.subr.bf16.mxu1 %v3124_v11  ;;  %v3126_v20 = vcombine.high %v140_v14, %v144_v15  ;;  %v3607_v22 = vld [vmem:[#allocation2] sm:$0xff]   ;;  %v3125_v25 = vcombine.low %v140_v14, %v144_v15  ;;  %v3134_v27 = vcombine.high %v148_v21, %v148_v21 }
  0x83   :  { %245 = vmatpush1.bf16.msra.mxu0 %v3121_v5  ;;  %v221_v19 = vsel %vm219_vm0, %v3129_v7, 0  ;;  %288 = vmatpush1.bf16.msra.mxu1 %v3123_v12  ;;  %v227_v23 = vsel %vm219_vm0, %v3131_v16, 0  ;;  %v3128_v24 = vcombine.high %v141_v17, %v145_v18  ;;  %v149_v26 = vld [vmem:[#allocation7 + $0x58] sm:$0xff]  ;;  %v3133_v28 = vcombine.low %v148_v21, %v148_v21  ;;  %v3616_v33 = vld [vmem:[#allocation8 + $0x4] ss:$16 sps:$4 sm:$0xff]  }
  0x84   :  { %3137 = vmatprep.subr.msk.bf16.mxu0 %vm219_vm0, %v3130_v6  ;;  %3139 = vmatprep.subr.msk.bf16.mxu1 %vm219_vm0, %v3132_v13  ;;  %v3127_v29 = vcombine.low %v141_v17, %v145_v18  ;;  %v3136_v30 = vcombine.high %v149_v26, %v149_v26  ;;  %v3135_v31 = vcombine.low %v149_v26, %v149_v26  ;;  %v3619_v35 = vld [vmem:[#allocation8 + $0xc] ss:$16 sps:$4 sm:$0xff]   ;;  %v3614_v36 = vld [vmem:[#allocation8] ss:$16 sps:$4 sm:$0xff]   ;;  %v3622_v37 = vld [vmem:[#allocation8 + $0x24] ss:$16 sps:$4 sm:$0xff]  }
  0x85   :  { %v233_v32 = vsel %vm219_vm0, %v3133_v28, 0  ;;  %v3617_v38 = vld [vmem:[#allocation8 + $0x8] ss:$16 sps:$4 sm:$0xff]   ;;  %v3625_v39 = vld [vmem:[#allocation8 + $0x2c] ss:$16 sps:$4 sm:$0xff]  }
  0x86   :  { %v239_v34 = vsel %vm219_vm0, %v3135_v31, 0  ;;  %v3620_v40 = vld [vmem:[#allocation8 + $0x20] ss:$16 sps:$4 sm:$0xff]   ;;  %v3628_v41 = vld [vmem:[#allocation8 + $0x44] ss:$16 sps:$4 sm:$0xff]  }
  0x87   :  { %247 = vmatpush1.bf16.msra.mxu0 %v221_v19  ;;  %290 = vmatpush1.bf16.msra.mxu1 %v227_v23  ;;  %v3623_v42 = vld [vmem:[#allocation8 + $0x28] ss:$16 sps:$4 sm:$0xff]   ;;  %v3631_v43 = vld [vmem:[#allocation8 + $0x4c] ss:$16 sps:$4 sm:$0xff]   ;;  %v3626_v44 = vld [vmem:[#allocation8 + $0x40] ss:$16 sps:$4 sm:$0xff]  }
  0x88   :  { %330 = vmatprep.subr.bf16.mxu0 %v3126_v20  ;;  %373 = vmatprep.subr.bf16.mxu1 %v3128_v24  ;;  %v3634_v45 = vld [vmem:[#allocation8 + $0x64] ss:$16 sps:$4 sm:$0xff]   ;;  %v3629_v46 = vld [vmem:[#allocation8 + $0x48] ss:$16 sps:$4 sm:$0xff]   ;;  %v3637_v47 = vld [vmem:[#allocation8 + $0x6c] ss:$16 sps:$4 sm:$0xff]  }
  0x89   :  { %v3632_v48 = vld [vmem:[#allocation8 + $0x60] ss:$16 sps:$4 sm:$0xff]   ;;  %v3640_v49 = vld [vmem:[#allocation8 + $0x84] ss:$16 sps:$4 sm:$0xff]   ;;  %v3635_v50 = vld [vmem:[#allocation8 + $0x68] ss:$16 sps:$4 sm:$0xff]  }
  0x8a   :  { %3138 = vmatmul.mubr.msk.bf16.vlgmr.msra.gmra.mrb[0].mxu0 %vm215_vm1, %v3607_v22  ;;  %3140 = vmatmul.mubr.msk.bf16.vlgmr.msra.gmra.mrb[0].mxu1 %vm215_vm1, %v3607_v22  ;;  %v3643_v51 = vld [vmem:[#allocation8 + $0x8c] ss:$16 sps:$4 sm:$0xff]   ;;  %v3638_v52 = vld [vmem:[#allocation8 + $0x80] ss:$16 sps:$4 sm:$0xff]   ;;  %v3646_v53 = vld [vmem:[#allocation8 + $0xa4] ss:$16 sps:$4 sm:$0xff]  }
  0x8b   :  { %331 = vmatpush1.bf16.msra.mxu0 %v3125_v25  ;;  %362 = vmatprep.mubr.bf16.mxu0 %v4251_v0  ;;  %v3641_v54 = vld [vmem:[#allocation8 + $0x88] ss:$16 sps:$4 sm:$0xff]   ;;  %v3649_v55 = vld [vmem:[#allocation8 + $0xac] ss:$16 sps:$4 sm:$0xff]   ;;  %v3644_v56 = vld [vmem:[#allocation8 + $0xa0] ss:$16 sps:$4 sm:$0xff]  }
  0x8c   :  { %3141 = vmatprep.subr.msk.bf16.mxu0 %vm219_vm0, %v3134_v27  ;;  %374 = vmatpush1.bf16.msra.mxu1 %v3127_v29  ;;  %v3647_v57 = vld [vmem:[#allocation8 + $0xa8] ss:$16 sps:$4 sm:$0xff]   ;;  %v3652_v58 = vld [vmem:[#allocation8 + $0xc4] ss:$16 sps:$4 sm:$0xff]   ;;  %v3650_v59 = vld [vmem:[#allocation8 + $0xc0] ss:$16 sps:$4 sm:$0xff]  }
  0x8d   :  { %405 = vmatprep.mubr.bf16.mxu1 %v4251_v0  ;;  %3143 = vmatprep.subr.msk.bf16.mxu1 %vm219_vm0, %v3136_v30  ;;  %v3655_v60 = vld [vmem:[#allocation8 + $0xcc] ss:$16 sps:$4 sm:$0xff]   ;;  %v3658_v61 = vld [vmem:[#allocation8 + $0xe4] ss:$16 sps:$4 sm:$0xff]   ;;  %v3653_v62 = vld [vmem:[#allocation8 + $0xc8] ss:$16 sps:$4 sm:$0xff]  }
  0x8e   :  { %v3661_v63 = vld [vmem:[#allocation8 + $0xec] ss:$16 sps:$4 sm:$0xff]   ;;  %v3656_v0 = vld [vmem:[#allocation8 + $0xe0] ss:$16 sps:$4 sm:$0xff]   ;;  %v3664_v1 = vld [vmem:[#allocation8 + $0x104] ss:$16 sps:$4 sm:$0xff]  }
  0x8f   :  { %333 = vmatpush1.bf16.msra.mxu0 %v233_v32  ;;  %v3659_v2 = vld [vmem:[#allocation8 + $0xe8] ss:$16 sps:$4 sm:$0xff]   ;;  %v3667_v3 = vld [vmem:[#allocation8 + $0x10c] ss:$16 sps:$4 sm:$0xff]   ;;  %v3662_v4 = vld [vmem:[#allocation8 + $0x100] ss:$16 sps:$4 sm:$0xff]  }
  0x90   :  { %2091 = vmatprep.subr.bf16.mxu0 %v3616_v33  ;;  %376 = vmatpush1.bf16.msra.mxu1 %v239_v34  ;;  %v3670_v5 = vld [vmem:[#allocation8 + $0x124] ss:$16 sps:$4 sm:$0xff]   ;;  %v3665_v6 = vld [vmem:[#allocation8 + $0x108] ss:$16 sps:$4 sm:$0xff]   ;;  %v3673_v7 = vld [vmem:[#allocation8 + $0x12c] ss:$16 sps:$4 sm:$0xff]  }
  0x91   :  { %2263 = vmatprep.subr.bf16.mxu1 %v3619_v35  ;;  %v3668_v8 = vld [vmem:[#allocation8 + $0x120] ss:$16 sps:$4 sm:$0xff]   ;;  %v3676_v9 = vld [vmem:[#allocation8 + $0x144] ss:$16 sps:$4 sm:$0xff]   ;;  %v3671_v10 = vld [vmem:[#allocation8 + $0x128] ss:$16 sps:$4 sm:$0xff]  }
  0x92   :  { %3142 = vmatmul.mubr.msk.bf16.vlgmr.msra.gmra.mrb[4].mxu0 %vm215_vm1, %v3607_v22  ;;  %v3679_v11 = vld [vmem:[#allocation8 + $0x14c] ss:$16 sps:$4 sm:$0xff]   ;;  %v3674_v12 = vld [vmem:[#allocation8 + $0x140] ss:$16 sps:$4 sm:$0xff]   ;;  %v3682_v13 = vld [vmem:[#allocation8 + $0x164] ss:$16 sps:$4 sm:$0xff]  }
  0x93   :  { %2092 = vmatpush1.bf16.msra.mxu0 %v3614_v36  ;;  %3144 = vmatmul.mubr.msk.bf16.vlgmr.msra.gmra.mrb[4].mxu1 %vm215_vm1, %v3607_v22  ;;  %v3677_v14 = vld [vmem:[#allocation8 + $0x148] ss:$16 sps:$4 sm:$0xff]   ;;  %v3685_v15 = vld [vmem:[#allocation8 + $0x16c] ss:$16 sps:$4 sm:$0xff]   ;;  %v3680_v16 = vld [vmem:[#allocation8 + $0x160] ss:$16 sps:$4 sm:$0xff]  }
  0x94   :  { %2093 = vmatprep.subr.bf16.mxu0 %v3622_v37  ;;  %2264 = vmatpush1.bf16.msra.mxu1 %v3617_v38  ;;  %v3688_v17 = vld [vmem:[#allocation8 + $0x184] ss:$16 sps:$4 sm:$0xff]   ;;  %v3683_v18 = vld [vmem:[#allocation8 + $0x168] ss:$16 sps:$4 sm:$0xff]   ;;  %v3691_v19 = vld [vmem:[#allocation8 + $0x18c] ss:$16 sps:$4 sm:$0xff]   ;;  %v430_v38 = vlaneseq }
  0x95   :  { %2265 = vmatprep.subr.bf16.mxu1 %v3625_v39  ;;  %v3686_v20 = vld [vmem:[#allocation8 + $0x180] ss:$16 sps:$4 sm:$0xff]   ;;  %v3689_v21 = vld [vmem:[#allocation8 + $0x188] ss:$16 sps:$4 sm:$0xff]   ;;  %v3694_v22 = vld [vmem:[#allocation8 + $0x1a4] ss:$16 sps:$4 sm:$0xff]  }
  0x96   :  { %v3697_v23 = vld [vmem:[#allocation8 + $0x1ac] ss:$16 sps:$4 sm:$0xff]   ;;  %v3692_v24 = vld [vmem:[#allocation8 + $0x1a0] ss:$16 sps:$4 sm:$0xff]   ;;  %v3695_v25 = vld [vmem:[#allocation8 + $0x1a8] ss:$16 sps:$4 sm:$0xff]  }
  0x97   :  { %2094 = vmatpush1.bf16.msra.mxu0 %v3620_v40  ;;  %v3700_v26 = vld [vmem:[#allocation8 + $0x1c4] ss:$16 sps:$4 sm:$0xff]   ;;  %v3703_v27 = vld [vmem:[#allocation8 + $0x1cc] ss:$16 sps:$4 sm:$0xff]   ;;  %v3698_v28 = vld [vmem:[#allocation8 + $0x1c0] ss:$16 sps:$4 sm:$0xff]  }
  0x98   :  { %2095 = vmatprep.subr.bf16.mxu0 %v3628_v41  ;;  %2266 = vmatpush1.bf16.msra.mxu1 %v3623_v42  ;;  %v3701_v29 = vld [vmem:[#allocation8 + $0x1c8] ss:$16 sps:$4 sm:$0xff]   ;;  %v3706_v30 = vld [vmem:[#allocation8 + $0x1e4] ss:$16 sps:$4 sm:$0xff]   ;;  %v3709_v31 = vld [vmem:[#allocation8 + $0x1ec] ss:$16 sps:$4 sm:$0xff]  }
  0x99   :  { %2267 = vmatprep.subr.bf16.mxu1 %v3631_v43  ;;  %v3704_v32 = vld [vmem:[#allocation8 + $0x1e0] ss:$16 sps:$4 sm:$0xff]   ;;  %v3707_v33 = vld [vmem:[#allocation8 + $0x1e8] ss:$16 sps:$4 sm:$0xff]   ;;  %v3712_v34 = vld [vmem:[#allocation8 + $0x204] ss:$16 sps:$4 sm:$0xff]  }
  0x9a   :  { %v3715_v35 = vld [vmem:[#allocation8 + $0x20c] ss:$16 sps:$4 sm:$0xff]   ;;  %v4252_v36 = vmov 1966171168   ;;  %v431_v40 = vshrl.u32 %v430_v38, 7  ;;  %v424_v42 = vld [vmem:[%s4572_s3] sm:$0xff] }
  0x9b   :  { %2096 = vmatpush1.bf16.msra.mxu0 %v3626_v44  ;;  %v428_v37 = vunpack.c.l.s4 %v4252_v36  ;;  %v3728_v36 = vld [vmem:[#allocation8 + $0x260] ss:$16 sps:$4 sm:$0xff]   ;;  %v3736_v38 = vld [vmem:[#allocation8 + $0x284] ss:$16 sps:$4 sm:$0xff]  }
  0x9c   :  { %2097 = vmatprep.subr.bf16.mxu0 %v3634_v45  ;;  %2268 = vmatpush1.bf16.msra.mxu1 %v3629_v46 }
  0x9d   :  { %2269 = vmatprep.subr.bf16.mxu1 %v3637_v47  ;;  %v429_v39 = vunpack.c.0.s8 %v428_v37  ;;  %v426_v47 = vcombine.high %v424_v42, %v424_v42  ;;  %v3731_v37 = vld [vmem:[#allocation8 + $0x268] ss:$16 sps:$4 sm:$0xff]  }
  0x9f   :  { %2098 = vmatpush1.bf16.msra.mxu0 %v3632_v48  ;;  %v4441_v41 = vsub.s32 %v429_v39, %v431_v40  ;;  %v3739_v39 = vld [vmem:[#allocation8 + $0x28c] ss:$16 sps:$4 sm:$0xff]  }
  0xa0   :  { %2099 = vmatprep.subr.bf16.mxu0 %v3640_v49  ;;  %2270 = vmatpush1.bf16.msra.mxu1 %v3635_v50  ;;  %v4453_v50 = vsub.s32 0, %v431_v40  ;;  %v3734_v40 = vld [vmem:[#allocation8 + $0x280] ss:$16 sps:$4 sm:$0xff]  }
  0xa1   :  { %2271 = vmatprep.subr.bf16.mxu1 %v3643_v51  ;;  %v433_v43 = vrot.slane %v424_v42, %v4441_v41  ;;  %v3737_v42 = vld [vmem:[#allocation8 + $0x288] ss:$16 sps:$4 sm:$0xff]  }
  0xa3   :  { %2100 = vmatpush1.bf16.msra.mxu0 %v3638_v52  ;;  %v441_v44 = vcombine.high %v433_v43, %v433_v43  ;;  %v4448_v45 = vrot.slane %v433_v43, %v4441_v41  ;;  %v4456_v52 = vrot.slane %v426_v47, %v4441_v41 }
  0xa4   :  { %2101 = vmatprep.subr.bf16.mxu0 %v3646_v53  ;;  %2272 = vmatpush1.bf16.msra.mxu1 %v3641_v54 }
  0xa5   :  { %2273 = vmatprep.subr.bf16.mxu1 %v3649_v55  ;;  %v463_v46 = vrot.slane %v441_v44, %v4441_v41  ;;  %v476_v49 = vpack.i.b16 %v4448_v45, %v4448_v45  ;;  %v3742_v44 = vld [vmem:[#allocation8 + $0x2a4] ss:$16 sps:$4 sm:$0xff]  }
  0xa7   :  { %2102 = vmatpush1.bf16.msra.mxu0 %v3644_v56  ;;  %v473_v48 = vcombine.high %v463_v46, %v463_v46  ;;  %v483_v51 = vpack.i.b16 %v463_v46, %v463_v46  ;;  %v481_v56 = vrot.slane %v476_v49, %v4453_v50  ;;  %v3745_v46 = vld [vmem:[#allocation8 + $0x2ac] ss:$16 sps:$4 sm:$0xff]  }
  0xa8   :  { %2103 = vmatprep.subr.bf16.mxu0 %v3652_v58  ;;  %2274 = vmatpush1.bf16.msra.mxu1 %v3647_v57  ;;  %v4461_v57 = vrot.slane %v4456_v52, %v4441_v41 }
  0xa9   :  { %2275 = vmatprep.subr.bf16.mxu1 %v3655_v60  ;;  %v497_v54 = vpack.i.b16 %v473_v48, %v473_v48 }
  0xaa   :  { %v472_v48 = vcombine.high %v4461_v57, %v4461_v57 }
  0xab   :  { %2104 = vmatpush1.bf16.msra.mxu0 %v3650_v59  ;;  %v488_v59 = vrot.slane %v483_v51, %v4453_v50 }
  0xac   :  { %2105 = vmatprep.subr.bf16.mxu0 %v3658_v61  ;;  %2276 = vmatpush1.bf16.msra.mxu1 %v3653_v62 }
  0xad   :  { %2277 = vmatprep.subr.bf16.mxu1 %v3661_v63 }
  0xaf   :  { %2106 = vmatpush1.bf16.msra.mxu0 %v3656_v0 }
  0xb0   :  { %2107 = vmatprep.subr.bf16.mxu0 %v3664_v1  ;;  %2278 = vmatpush1.bf16.msra.mxu1 %v3659_v2  ;;  %v502_v2 = vrot.slane %v497_v54, %v4453_v50  ;;  %v3740_v54 = vld [vmem:[#allocation8 + $0x2a0] ss:$16 sps:$4 sm:$0xff]  }
  0xb1   :  { %2279 = vmatprep.subr.bf16.mxu1 %v3667_v3 }
  0xb3   :  { %2108 = vmatpush1.bf16.msra.mxu0 %v3662_v4 }
  0xb4   :  { %2109 = vmatprep.subr.bf16.mxu0 %v3670_v5  ;;  %2280 = vmatpush1.bf16.msra.mxu1 %v3665_v6  ;;  %v504_v6 = vpack.i.b16 %v4461_v57, %v4461_v57  ;;  %v3746_v57 = vld [vmem:[#allocation8 + $0x2c0] ss:$16 sps:$4 sm:$0xff]  }
  0xb5   :  { %2281 = vmatprep.subr.bf16.mxu1 %v3673_v7 }
  0xb7   :  { %2110 = vmatpush1.bf16.msra.mxu0 %v3668_v8 }
  0xb8   :  { %2111 = vmatprep.subr.bf16.mxu0 %v3676_v9  ;;  %2282 = vmatpush1.bf16.msra.mxu1 %v3671_v10 }
  0xb9   :  { %2283 = vmatprep.subr.bf16.mxu1 %v3679_v11 }
  0xbb   :  { %2112 = vmatpush1.bf16.msra.mxu0 %v3674_v12 }
  0xbc   :  { %2113 = vmatprep.subr.bf16.mxu0 %v3682_v13  ;;  %2284 = vmatpush1.bf16.msra.mxu1 %v3677_v14  ;;  %v3710_v13 = vld [vmem:[#allocation8 + $0x200] ss:$16 sps:$4 sm:$0xff]  }
  0xbd   :  { %2285 = vmatprep.subr.bf16.mxu1 %v3685_v15  ;;  %v509_v15 = vrot.slane %v504_v6, %v4453_v50  ;;  %v3755_v6 = vld [vmem:[#allocation8 + $0x2e8] ss:$16 sps:$4 sm:$0xff]  }
  0xbf   :  { %2114 = vmatpush1.bf16.msra.mxu0 %v3680_v16 }
  0xc0   :  { %2115 = vmatprep.subr.bf16.mxu0 %v3688_v17  ;;  %2286 = vmatpush1.bf16.msra.mxu1 %v3683_v18  ;;  %v3713_v17 = vld [vmem:[#allocation8 + $0x208] ss:$16 sps:$4 sm:$0xff]  }
  0xc1   :  { %2287 = vmatprep.subr.bf16.mxu1 %v3691_v19 }
  0xc3   :  { %2116 = vmatpush1.bf16.msra.mxu0 %v3686_v20 }
  0xc4   :  { %2288 = vmatpush1.bf16.msra.mxu1 %v3689_v21  ;;  %2117 = vmatprep.subr.bf16.mxu0 %v3694_v22  ;;  %v3718_v21 = vld [vmem:[#allocation8 + $0x224] ss:$16 sps:$4 sm:$0xff]   ;;  %v3721_v22 = vld [vmem:[#allocation8 + $0x22c] ss:$16 sps:$4 sm:$0xff]  }
  0xc5   :  { %2289 = vmatprep.subr.bf16.mxu1 %v3697_v23 }
  0xc7   :  { %2118 = vmatpush1.bf16.msra.mxu0 %v3692_v24 }
  0xc8   :  { %2290 = vmatpush1.bf16.msra.mxu1 %v3695_v25  ;;  %2119 = vmatprep.subr.bf16.mxu0 %v3700_v26 }
  0xc9   :  { %2291 = vmatprep.subr.bf16.mxu1 %v3703_v27 }
  0xcb   :  { %2120 = vmatpush1.bf16.msra.mxu0 %v3698_v28  ;;  %v3716_v28 = vld [vmem:[#allocation8 + $0x220] ss:$16 sps:$4 sm:$0xff]  }
  0xcc   :  { %2292 = vmatpush1.bf16.msra.mxu1 %v3701_v29  ;;  %2121 = vmatprep.subr.bf16.mxu0 %v3706_v30  ;;  %v3719_v29 = vld [vmem:[#allocation8 + $0x228] ss:$16 sps:$4 sm:$0xff]   ;;  %v3724_v30 = vld [vmem:[#allocation8 + $0x244] ss:$16 sps:$4 sm:$0xff]  }
  0xcd   :  { %2293 = vmatprep.subr.bf16.mxu1 %v3709_v31  ;;  %v3727_v31 = vld [vmem:[#allocation8 + $0x24c] ss:$16 sps:$4 sm:$0xff]  }
  0xcf   :  { %2122 = vmatpush1.bf16.msra.mxu0 %v3704_v32  ;;  %v3722_v32 = vld [vmem:[#allocation8 + $0x240] ss:$16 sps:$4 sm:$0xff]  }
  0xd0   :  { %2294 = vmatpush1.bf16.msra.mxu1 %v3707_v33  ;;  %2134 = vmatprep.subr.bf16.mxu0 %v3712_v34  ;;  %v3725_v33 = vld [vmem:[#allocation8 + $0x248] ss:$16 sps:$4 sm:$0xff]   ;;  %v3730_v34 = vld [vmem:[#allocation8 + $0x264] ss:$16 sps:$4 sm:$0xff]  }
  0xd1   :  { %2306 = vmatprep.subr.bf16.mxu1 %v3715_v35  ;;  %v3733_v35 = vld [vmem:[#allocation8 + $0x26c] ss:$16 sps:$4 sm:$0xff]  }
 0x15d   :  { %v278_v53 = vpop.f32.mrb[0].mxu0  ;;  %v4464_v60 = vpop.f32.mrb[0].mxu1 }
 0x15e   :  { %v280_v55 = vpop.f32.mrb[1].mxu0  ;;  %v323_v63 = vpop.f32.mrb[1].mxu1 }
 0x15f   :  { %v282_v58 = vpop.f32.mrb[2].mxu0  ;;  %v4466_v1 = vpop.f32.mrb[2].mxu1 }
 0x160   :  { %v416_v61 = vpack.c.bf16 %v282_v58, %v278_v53  ;;  %v284_v62 = vpop.f32.mrb[3].mxu0  ;;  %v418_v4 = vpack.c.bf16 %v4466_v1, %v4464_v60  ;;  %v327_v5 = vpop.f32.mrb[3].mxu1  ;;  %v518_v53 = vpack.i.b16 %v472_v48, %v472_v48  ;;  %v3748_v58 = vld [vmem:[#allocation8 + $0x2c4] ss:$16 sps:$4 sm:$0xff]   ;;  %v3806_v60 = vld [vmem:[#allocation8 + $0x400] ss:$16 sps:$4 sm:$0xff]  }
 0x161   :  { %v417_v0 = vpack.c.bf16 %v284_v62, %v280_v55  ;;  %v419_v8 = vpack.c.bf16 %v327_v5, %v323_v63  ;;  %v3743_v55 = vld [vmem:[#allocation8 + $0x2a8] ss:$16 sps:$4 sm:$0xff]   ;;  %v3752_v5 = vld [vmem:[#allocation8 + $0x2e0] ss:$16 sps:$4 sm:$0xff]   ;;  %v3802_v48 = vld [vmem:[#allocation8 + $0x3e4] ss:$16 sps:$4 sm:$0xff]  }
 0x162   :  { %v531_v3 = vadd.bf16 %v481_v56, %v416_v61  ;;  %v523_v61 = vrot.slane %v518_v53, %v4453_v50  ;;  %v3800_v53 = vld [vmem:[#allocation8 + $0x3e0] ss:$16 sps:$4 sm:$0xff]   ;;  %v3809_v1 = vld [vmem:[#allocation8 + $0x408] ss:$16 sps:$4 sm:$0xff]  }
 0x163   :  { %v532_v7 = vadd.bf16 %v488_v59, %v417_v0  ;;  %v534_v11 = vadd.bf16 %v502_v2, %v419_v8  ;;  %v3751_v59 = vld [vmem:[#allocation8 + $0x2cc] ss:$16 sps:$4 sm:$0xff]   ;;  %v3749_v0 = vld [vmem:[#allocation8 + $0x2c8] ss:$16 sps:$4 sm:$0xff]   ;;  %v3754_v2 = vld [vmem:[#allocation8 + $0x2e4] ss:$16 sps:$4 sm:$0xff]  }
 0x164   :  { %v539_v9 = vmul.bf16 1045249613, %v531_v3  ;;  %v3763_v8 = vld [vmem:[#allocation8 + $0x30c] ss:$16 sps:$4 sm:$0xff]  }
 0x165   :  { %v540_v10 = vmul.bf16 1045249613, %v532_v7  ;;  %v364_v12 = vpop.f32.mrb[4].mxu0  ;;  %v542_v18 = vmul.bf16 1045249613, %v534_v11 }
 0x166   :  { %v4473_v14 = vpop.f32.mrb[5].mxu0  ;;  %v547_v20 = vmax.bf16 %v539_v9, %v531_v3  ;;  %v407_v43 = vpop.f32.mrb[4].mxu1  ;;  %v3757_v3 = vld [vmem:[#allocation8 + $0x2ec] ss:$16 sps:$4 sm:$0xff]   ;;  %v3758_v9 = vld [vmem:[#allocation8 + $0x300] ss:$16 sps:$4 sm:$0xff]  }
 0x167   :  { %v548_v16 = vmax.bf16 %v540_v10, %v532_v7  ;;  %v368_v19 = vpop.f32.mrb[6].mxu0  ;;  %v550_v25 = vmax.bf16 %v542_v18, %v534_v11  ;;  %v4482_v47 = vpop.f32.mrb[5].mxu1  ;;  %v3760_v7 = vld [vmem:[#allocation8 + $0x304] ss:$16 sps:$4 sm:$0xff]   ;;  %v3761_v10 = vld [vmem:[#allocation8 + $0x308] ss:$16 sps:$4 sm:$0xff]  }
 0x168   :  { %v420_v23 = vpack.c.bf16 %v368_v19, %v364_v12  ;;  %v4476_v24 = vpop.f32.mrb[7].mxu0  ;;  %v411_v49 = vpop.f32.mrb[6].mxu1  ;;  %v3766_v11 = vld [vmem:[#allocation8 + $0x324] ss:$16 sps:$4 sm:$0xff]   ;;  %v3769_v12 = vld [vmem:[#allocation8 + $0x32c] ss:$16 sps:$4 sm:$0xff]  }
 0x169   :  { %2123 = vmatprep.mubr.bf16.mxu0 %v548_v16  ;;  %2295 = vmatprep.mubr.bf16.mxu1 %v548_v16  ;;  %v421_v26 = vpack.c.bf16 %v4476_v24, %v4473_v14  ;;  %v422_v51 = vpack.c.bf16 %v411_v49, %v407_v43  ;;  %v4486_v56 = vpop.f32.mrb[7].mxu1  ;;  %v3772_v16 = vld [vmem:[#allocation8 + $0x344] ss:$16 sps:$4 sm:$0xff]   ;;  %v3770_v18 = vld [vmem:[#allocation8 + $0x340] ss:$16 sps:$4 sm:$0xff]  }
 0x16a   :  { %2124 = vmatmul.mubr.bf16.vlgmr.msra.gmra.mrb[8].mxu0 %v547_v20  ;;  %2296 = vmatmul.mubr.bf16.vlgmr.msra.gmra.mrb[8].mxu1 %v547_v20  ;;  %v4480_v27 = vadd.bf16 %v509_v15, %v420_v23  ;;  %v423_v62 = vpack.c.bf16 %v4486_v56, %v4482_v47  ;;  %v3767_v15 = vld [vmem:[#allocation8 + $0x328] ss:$16 sps:$4 sm:$0xff]   ;;  %v3778_v20 = vld [vmem:[#allocation8 + $0x364] ss:$16 sps:$4 sm:$0xff]   ;;  %v3776_v23 = vld [vmem:[#allocation8 + $0x360] ss:$16 sps:$4 sm:$0xff]  }
 0x16b   :  { %2135 = vmatpush1.bf16.msra.mxu0 %v3710_v13  ;;  %2307 = vmatpush1.bf16.msra.mxu1 %v3713_v17  ;;  %v4491_v63 = vadd.bf16 %v523_v61, %v422_v51  ;;  %v3764_v13 = vld [vmem:[#allocation8 + $0x320] ss:$16 sps:$4 sm:$0xff]   ;;  %v3775_v17 = vld [vmem:[#allocation8 + $0x34c] ss:$16 sps:$4 sm:$0xff]   ;;  %v3773_v19 = vld [vmem:[#allocation8 + $0x348] ss:$16 sps:$4 sm:$0xff]  }
 0x16c   :  { %2136 = vmatprep.subr.bf16.mxu0 %v3718_v21  ;;  %2308 = vmatprep.subr.bf16.mxu1 %v3721_v22  ;;  %v3781_v21 = vld [vmem:[#allocation8 + $0x36c] ss:$16 sps:$4 sm:$0xff]   ;;  %v442_v22 = vcombine.high %v4456_v52, %v4456_v52  ;;  %v3794_v43 = vld [vmem:[#allocation8 + $0x3c0] ss:$16 sps:$4 sm:$0xff]   ;;  %v3911_v47 = vld [vmem:[#allocation8 + $0x624] ss:$16 sps:$4 sm:$0xff]  }
 0x16d   :  { %2166 = vmatprep.mubr.bf16.mxu0 %v550_v25  ;;  %2338 = vmatprep.mubr.bf16.mxu1 %v550_v25  ;;  %v3779_v25 = vld [vmem:[#allocation8 + $0x368] ss:$16 sps:$4 sm:$0xff]   ;;  %v3805_v49 = vld [vmem:[#allocation8 + $0x3ec] ss:$16 sps:$4 sm:$0xff]  }
 0x16e   :  { %v3817_v14 = vld [vmem:[#allocation8 + $0x42c] ss:$16 sps:$4 sm:$0xff]  }
 0x16f   :  { %2137 = vmatpush1.bf16.msra.mxu0 %v3716_v28  ;;  %2309 = vmatpush1.bf16.msra.mxu1 %v3719_v29  ;;  %v3784_v28 = vld [vmem:[#allocation8 + $0x384] ss:$16 sps:$4 sm:$0xff]   ;;  %v3787_v29 = vld [vmem:[#allocation8 + $0x38c] ss:$16 sps:$4 sm:$0xff]  }
 0x170   :  { %2138 = vmatprep.subr.bf16.mxu0 %v3724_v30  ;;  %2310 = vmatprep.subr.bf16.mxu1 %v3727_v31  ;;  %v471_v30 = vcombine.high %v4448_v45, %v4448_v45  ;;  %v4498_v31 = vrot.slane %v442_v22, %v4441_v41  ;;  %v3842_v22 = vld [vmem:[#allocation8 + $0x4c0] ss:$16 sps:$4 sm:$0xff]   ;;  %v3914_v56 = vld [vmem:[#allocation8 + $0x62c] ss:$16 sps:$4 sm:$0xff]  }
 0x172   :  { %v490_v52 = vpack.i.b16 %v471_v30, %v471_v30  ;;  %v3851_v30 = vld [vmem:[#allocation8 + $0x4e8] ss:$16 sps:$4 sm:$0xff]  }
 0x173   :  { %2139 = vmatpush1.bf16.msra.mxu0 %v3722_v32  ;;  %2311 = vmatpush1.bf16.msra.mxu1 %v3725_v33  ;;  %v3782_v32 = vld [vmem:[#allocation8 + $0x380] ss:$16 sps:$4 sm:$0xff]   ;;  %v3785_v33 = vld [vmem:[#allocation8 + $0x388] ss:$16 sps:$4 sm:$0xff]  }
 0x174   :  { %2140 = vmatprep.subr.bf16.mxu0 %v3730_v34  ;;  %2312 = vmatprep.subr.bf16.mxu1 %v3733_v35  ;;  %v3790_v34 = vld [vmem:[#allocation8 + $0x3a4] ss:$16 sps:$4 sm:$0xff]   ;;  %v3793_v35 = vld [vmem:[#allocation8 + $0x3ac] ss:$16 sps:$4 sm:$0xff]   ;;  %v495_v45 = vrot.slane %v490_v52, %v4453_v50  ;;  %v3854_v52 = vld [vmem:[#allocation8 + $0x500] ss:$16 sps:$4 sm:$0xff]  }
 0x177   :  { %2141 = vmatpush1.bf16.msra.mxu0 %v3728_v36  ;;  %2313 = vmatpush1.bf16.msra.mxu1 %v3731_v37  ;;  %v511_v36 = vpack.i.b16 %v4498_v31, %v4498_v31  ;;  %v3788_v37 = vld [vmem:[#allocation8 + $0x3a0] ss:$16 sps:$4 sm:$0xff]  }
 0x178   :  { %2142 = vmatprep.subr.bf16.mxu0 %v3736_v38  ;;  %2314 = vmatprep.subr.bf16.mxu1 %v3739_v39  ;;  %v3791_v38 = vld [vmem:[#allocation8 + $0x3a8] ss:$16 sps:$4 sm:$0xff]   ;;  %v3796_v39 = vld [vmem:[#allocation8 + $0x3c4] ss:$16 sps:$4 sm:$0xff]  }
 0x17b   :  { %2143 = vmatpush1.bf16.msra.mxu0 %v3734_v40  ;;  %2315 = vmatpush1.bf16.msra.mxu1 %v3737_v42  ;;  %v3799_v40 = vld [vmem:[#allocation8 + $0x3cc] ss:$16 sps:$4 sm:$0xff]   ;;  %v516_v42 = vrot.slane %v511_v36, %v4453_v50 }
 0x17c   :  { %2144 = vmatprep.subr.bf16.mxu0 %v3742_v44  ;;  %2316 = vmatprep.subr.bf16.mxu1 %v3745_v46  ;;  %v3797_v44 = vld [vmem:[#allocation8 + $0x3c8] ss:$16 sps:$4 sm:$0xff]   ;;  %v533_v46 = vadd.bf16 %v495_v45, %v418_v4  ;;  %v3865_v36 = vld [vmem:[#allocation8 + $0x52c] ss:$16 sps:$4 sm:$0xff]   ;;  %v3868_v45 = vld [vmem:[#allocation8 + $0x544] ss:$16 sps:$4 sm:$0xff]  }
 0x17d   :  { %v536_v51 = vadd.bf16 %v516_v42, %v421_v26  ;;  %v3812_v26 = vld [vmem:[#allocation8 + $0x420] ss:$16 sps:$4 sm:$0xff]   ;;  %v3869_v42 = vld [vmem:[#allocation8 + $0x548] ss:$16 sps:$4 sm:$0xff]  }
 0x17f   :  { %2145 = vmatpush1.bf16.msra.mxu0 %v3740_v54  ;;  %2317 = vmatpush1.bf16.msra.mxu1 %v3743_v55  ;;  %v3803_v54 = vld [vmem:[#allocation8 + $0x3e8] ss:$16 sps:$4 sm:$0xff]   ;;  %v541_v55 = vmul.bf16 1045249613, %v533_v46  ;;  %v544_v61 = vmul.bf16 1045249613, %v536_v51 }
 0x180   :  { %2146 = vmatprep.subr.bf16.mxu0 %v3748_v58  ;;  %2318 = vmatprep.subr.bf16.mxu1 %v3751_v59  ;;  %v3808_v58 = vld [vmem:[#allocation8 + $0x404] ss:$16 sps:$4 sm:$0xff]   ;;  %v3811_v59 = vld [vmem:[#allocation8 + $0x40c] ss:$16 sps:$4 sm:$0xff]  }
 0x181   :  { %v549_v4 = vmax.bf16 %v541_v55, %v533_v46  ;;  %v552_v24 = vmax.bf16 %v544_v61, %v536_v51  ;;  %v3872_v46 = vld [vmem:[#allocation8 + $0x560] ss:$16 sps:$4 sm:$0xff]   ;;  %v3883_v51 = vld [vmem:[#allocation8 + $0x58c] ss:$16 sps:$4 sm:$0xff]   ;;  %v3881_v55 = vld [vmem:[#allocation8 + $0x588] ss:$16 sps:$4 sm:$0xff]  }
 0x183   :  { %2147 = vmatpush1.bf16.msra.mxu0 %v3746_v57  ;;  %2319 = vmatpush1.bf16.msra.mxu1 %v3749_v0  ;;  %v3814_v57 = vld [vmem:[#allocation8 + $0x424] ss:$16 sps:$4 sm:$0xff]   ;;  %v3815_v0 = vld [vmem:[#allocation8 + $0x428] ss:$16 sps:$4 sm:$0xff]  }
 0x184   :  { %2148 = vmatprep.subr.bf16.mxu0 %v3754_v2  ;;  %2320 = vmatprep.subr.bf16.mxu1 %v3757_v3  ;;  %v3820_v2 = vld [vmem:[#allocation8 + $0x444] ss:$16 sps:$4 sm:$0xff]   ;;  %v3823_v3 = vld [vmem:[#allocation8 + $0x44c] ss:$16 sps:$4 sm:$0xff]  }
 0x187   :  { %2149 = vmatpush1.bf16.msra.mxu0 %v3752_v5  ;;  %2321 = vmatpush1.bf16.msra.mxu1 %v3755_v6  ;;  %v3818_v5 = vld [vmem:[#allocation8 + $0x440] ss:$16 sps:$4 sm:$0xff]   ;;  %v3821_v6 = vld [vmem:[#allocation8 + $0x448] ss:$16 sps:$4 sm:$0xff]  }
 0x188   :  { %2150 = vmatprep.subr.bf16.mxu0 %v3760_v7  ;;  %2322 = vmatprep.subr.bf16.mxu1 %v3763_v8  ;;  %v3826_v7 = vld [vmem:[#allocation8 + $0x464] ss:$16 sps:$4 sm:$0xff]   ;;  %v3829_v8 = vld [vmem:[#allocation8 + $0x46c] ss:$16 sps:$4 sm:$0xff]  }
 0x18b   :  { %2151 = vmatpush1.bf16.msra.mxu0 %v3758_v9  ;;  %2323 = vmatpush1.bf16.msra.mxu1 %v3761_v10  ;;  %v3824_v9 = vld [vmem:[#allocation8 + $0x460] ss:$16 sps:$4 sm:$0xff]   ;;  %v3827_v10 = vld [vmem:[#allocation8 + $0x468] ss:$16 sps:$4 sm:$0xff]  }
 0x18c   :  { %2152 = vmatprep.subr.bf16.mxu0 %v3766_v11  ;;  %2324 = vmatprep.subr.bf16.mxu1 %v3769_v12  ;;  %v3832_v11 = vld [vmem:[#allocation8 + $0x484] ss:$16 sps:$4 sm:$0xff]   ;;  %v3835_v12 = vld [vmem:[#allocation8 + $0x48c] ss:$16 sps:$4 sm:$0xff]  }
 0x18f   :  { %2153 = vmatpush1.bf16.msra.mxu0 %v3764_v13  ;;  %2325 = vmatpush1.bf16.msra.mxu1 %v3767_v15  ;;  %v3830_v13 = vld [vmem:[#allocation8 + $0x480] ss:$16 sps:$4 sm:$0xff]   ;;  %v3833_v15 = vld [vmem:[#allocation8 + $0x488] ss:$16 sps:$4 sm:$0xff]  }
 0x190   :  { %2154 = vmatprep.subr.bf16.mxu0 %v3772_v16  ;;  %2326 = vmatprep.subr.bf16.mxu1 %v3775_v17  ;;  %v3838_v16 = vld [vmem:[#allocation8 + $0x4a4] ss:$16 sps:$4 sm:$0xff]   ;;  %v3841_v17 = vld [vmem:[#allocation8 + $0x4ac] ss:$16 sps:$4 sm:$0xff]  }
 0x193   :  { %2155 = vmatpush1.bf16.msra.mxu0 %v3770_v18  ;;  %2327 = vmatpush1.bf16.msra.mxu1 %v3773_v19  ;;  %v3836_v18 = vld [vmem:[#allocation8 + $0x4a0] ss:$16 sps:$4 sm:$0xff]   ;;  %v3839_v19 = vld [vmem:[#allocation8 + $0x4a8] ss:$16 sps:$4 sm:$0xff]  }
 0x194   :  { %2156 = vmatprep.subr.bf16.mxu0 %v3778_v20  ;;  %2328 = vmatprep.subr.bf16.mxu1 %v3781_v21  ;;  %v3844_v20 = vld [vmem:[#allocation8 + $0x4c4] ss:$16 sps:$4 sm:$0xff]   ;;  %v3847_v21 = vld [vmem:[#allocation8 + $0x4cc] ss:$16 sps:$4 sm:$0xff]  }
 0x197   :  { %2157 = vmatpush1.bf16.msra.mxu0 %v3776_v23  ;;  %2329 = vmatpush1.bf16.msra.mxu1 %v3779_v25  ;;  %v3845_v23 = vld [vmem:[#allocation8 + $0x4c8] ss:$16 sps:$4 sm:$0xff]   ;;  %v3850_v25 = vld [vmem:[#allocation8 + $0x4e4] ss:$16 sps:$4 sm:$0xff]  }
 0x198   :  { %2158 = vmatprep.subr.bf16.mxu0 %v3784_v28  ;;  %2330 = vmatprep.subr.bf16.mxu1 %v3787_v29  ;;  %v3853_v28 = vld [vmem:[#allocation8 + $0x4ec] ss:$16 sps:$4 sm:$0xff]   ;;  %v3848_v29 = vld [vmem:[#allocation8 + $0x4e0] ss:$16 sps:$4 sm:$0xff]  }
 0x19b   :  { %2159 = vmatpush1.bf16.msra.mxu0 %v3782_v32  ;;  %2331 = vmatpush1.bf16.msra.mxu1 %v3785_v33  ;;  %v3856_v32 = vld [vmem:[#allocation8 + $0x504] ss:$16 sps:$4 sm:$0xff]   ;;  %v3859_v33 = vld [vmem:[#allocation8 + $0x50c] ss:$16 sps:$4 sm:$0xff]  }
 0x19c   :  { %2160 = vmatprep.subr.bf16.mxu0 %v3790_v34  ;;  %2332 = vmatprep.subr.bf16.mxu1 %v3793_v35  ;;  %v3857_v34 = vld [vmem:[#allocation8 + $0x508] ss:$16 sps:$4 sm:$0xff]   ;;  %v3862_v35 = vld [vmem:[#allocation8 + $0x524] ss:$16 sps:$4 sm:$0xff]  }
 0x19f   :  { %2161 = vmatpush1.bf16.msra.mxu0 %v3788_v37  ;;  %2333 = vmatpush1.bf16.msra.mxu1 %v3791_v38  ;;  %v3860_v37 = vld [vmem:[#allocation8 + $0x520] ss:$16 sps:$4 sm:$0xff]   ;;  %v3863_v38 = vld [vmem:[#allocation8 + $0x528] ss:$16 sps:$4 sm:$0xff]  }
 0x1a0   :  { %2162 = vmatprep.subr.bf16.mxu0 %v3796_v39  ;;  %2334 = vmatprep.subr.bf16.mxu1 %v3799_v40  ;;  %v3871_v39 = vld [vmem:[#allocation8 + $0x54c] ss:$16 sps:$4 sm:$0xff]   ;;  %v3866_v40 = vld [vmem:[#allocation8 + $0x540] ss:$16 sps:$4 sm:$0xff]  }
 0x1a3   :  { %2163 = vmatpush1.bf16.msra.mxu0 %v3794_v43  ;;  %2335 = vmatpush1.bf16.msra.mxu1 %v3797_v44  ;;  %v3874_v43 = vld [vmem:[#allocation8 + $0x564] ss:$16 sps:$4 sm:$0xff]   ;;  %v3877_v44 = vld [vmem:[#allocation8 + $0x56c] ss:$16 sps:$4 sm:$0xff]  }
 0x1a4   :  { %2164 = vmatprep.subr.bf16.mxu0 %v3802_v48  ;;  %2336 = vmatprep.subr.bf16.mxu1 %v3805_v49  ;;  %v3875_v48 = vld [vmem:[#allocation8 + $0x568] ss:$16 sps:$4 sm:$0xff]   ;;  %v3880_v49 = vld [vmem:[#allocation8 + $0x584] ss:$16 sps:$4 sm:$0xff]  }
 0x1a7   :  { %2165 = vmatpush1.bf16.msra.mxu0 %v3800_v53  ;;  %2337 = vmatpush1.bf16.msra.mxu1 %v3803_v54  ;;  %v474_v53 = vcombine.high %v4498_v31, %v4498_v31  ;;  %v3878_v54 = vld [vmem:[#allocation8 + $0x580] ss:$16 sps:$4 sm:$0xff]  }
 0x1a8   :  { %2177 = vmatprep.subr.bf16.mxu0 %v3808_v58  ;;  %2349 = vmatprep.subr.bf16.mxu1 %v3811_v59  ;;  %v3887_v58 = vld [vmem:[#allocation8 + $0x5a4] ss:$16 sps:$4 sm:$0xff]   ;;  %v3890_v59 = vld [vmem:[#allocation8 + $0x5ac] ss:$16 sps:$4 sm:$0xff]   ;;  %v3891_v31 = vld [vmem:[#allocation8 + $0x5c0] ss:$16 sps:$4 sm:$0xff]  }
 0x1a9   :  { %v525_v61 = vpack.i.b16 %v474_v53, %v474_v53  ;;  %v3960_v53 = vld [vmem:[#allocation8 + $0x728] ss:$16 sps:$4 sm:$0xff]  }
 0x1aa   :  { %2167 = vmatmul.mubr.bf16.vlgmr.msra.gmra.mrb[8].mxu0 %v549_v4  ;;  %2339 = vmatmul.mubr.bf16.vlgmr.msra.gmra.mrb[8].mxu1 %v549_v4  ;;  %v3893_v4 = vld [vmem:[#allocation8 + $0x5c4] ss:$16 sps:$4 sm:$0xff]  }
 0x1ab   :  { %2178 = vmatpush1.bf16.msra.mxu0 %v3806_v60  ;;  %2350 = vmatpush1.bf16.msra.mxu1 %v3809_v1  ;;  %v3885_v60 = vld [vmem:[#allocation8 + $0x5a0] ss:$16 sps:$4 sm:$0xff]   ;;  %v3888_v1 = vld [vmem:[#allocation8 + $0x5a8] ss:$16 sps:$4 sm:$0xff]  }
 0x1ac   :  { %2179 = vmatprep.subr.bf16.mxu0 %v3814_v57  ;;  %2351 = vmatprep.subr.bf16.mxu1 %v3817_v14  ;;  %v3896_v57 = vld [vmem:[#allocation8 + $0x5cc] ss:$16 sps:$4 sm:$0xff]   ;;  %v530_v14 = vrot.slane %v525_v61, %v4453_v50  ;;  %v3971_v61 = vld [vmem:[#allocation8 + $0x764] ss:$16 sps:$4 sm:$0xff]  }
 0x1ad   :  { %2209 = vmatprep.mubr.bf16.mxu0 %v552_v24  ;;  %2381 = vmatprep.mubr.bf16.mxu1 %v552_v24  ;;  %v3894_v24 = vld [vmem:[#allocation8 + $0x5c8] ss:$16 sps:$4 sm:$0xff]  }
 0x1af   :  { %2180 = vmatpush1.bf16.msra.mxu0 %v3812_v26  ;;  %2352 = vmatpush1.bf16.msra.mxu1 %v3815_v0  ;;  %v3899_v26 = vld [vmem:[#allocation8 + $0x5e4] ss:$16 sps:$4 sm:$0xff]   ;;  %v3902_v0 = vld [vmem:[#allocation8 + $0x5ec] ss:$16 sps:$4 sm:$0xff]  }
 0x1b0   :  { %2181 = vmatprep.subr.bf16.mxu0 %v3820_v2  ;;  %2353 = vmatprep.subr.bf16.mxu1 %v3823_v3  ;;  %v538_v2 = vadd.bf16 %v530_v14, %v423_v62  ;;  %v3897_v3 = vld [vmem:[#allocation8 + $0x5e0] ss:$16 sps:$4 sm:$0xff]   ;;  %v3980_v14 = vld [vmem:[#allocation8 + $0x78c] ss:$16 sps:$4 sm:$0xff]  }
 0x1b3   :  { %2182 = vmatpush1.bf16.msra.mxu0 %v3818_v5  ;;  %2354 = vmatpush1.bf16.msra.mxu1 %v3821_v6  ;;  %v3900_v5 = vld [vmem:[#allocation8 + $0x5e8] ss:$16 sps:$4 sm:$0xff]   ;;  %v543_v6 = vmul.bf16 1045249613, %v4480_v27 }
 0x1b4   :  { %2183 = vmatprep.subr.bf16.mxu0 %v3826_v7  ;;  %2355 = vmatprep.subr.bf16.mxu1 %v3829_v8  ;;  %v3905_v7 = vld [vmem:[#allocation8 + $0x604] ss:$16 sps:$4 sm:$0xff]   ;;  %v3908_v8 = vld [vmem:[#allocation8 + $0x60c] ss:$16 sps:$4 sm:$0xff]  }
 0x1b7   :  { %2184 = vmatpush1.bf16.msra.mxu0 %v3824_v9  ;;  %2356 = vmatpush1.bf16.msra.mxu1 %v3827_v10  ;;  %v546_v9 = vmul.bf16 1045249613, %v538_v2  ;;  %v3903_v10 = vld [vmem:[#allocation8 + $0x600] ss:$16 sps:$4 sm:$0xff]  }
 0x1b8   :  { %2185 = vmatprep.subr.bf16.mxu0 %v3832_v11  ;;  %2357 = vmatprep.subr.bf16.mxu1 %v3835_v12  ;;  %v3906_v11 = vld [vmem:[#allocation8 + $0x608] ss:$16 sps:$4 sm:$0xff]   ;;  %v551_v12 = vmax.bf16 %v543_v6, %v4480_v27  ;;  %v3915_v27 = vld [vmem:[#allocation8 + $0x640] ss:$16 sps:$4 sm:$0xff]   ;;  %v3992_v6 = vld [vmem:[#allocation8 + $0x7cc] ss:$16 sps:$4 sm:$0xff]  }
 0x1b9   :  { %v554_v62 = vmax.bf16 %v546_v9, %v538_v2  ;;  %v3981_v2 = vld [vmem:[#allocation8 + $0x7a0] ss:$16 sps:$4 sm:$0xff]   ;;  %v3995_v9 = vld [vmem:[#allocation8 + $0x7e4] ss:$16 sps:$4 sm:$0xff]  }
 0x1bb   :  { %2186 = vmatpush1.bf16.msra.mxu0 %v3830_v13  ;;  %2358 = vmatpush1.bf16.msra.mxu1 %v3833_v15  ;;  %v3909_v13 = vld [vmem:[#allocation8 + $0x620] ss:$16 sps:$4 sm:$0xff]   ;;  %v3912_v15 = vld [vmem:[#allocation8 + $0x628] ss:$16 sps:$4 sm:$0xff]  }
 0x1bc   :  { %2187 = vmatprep.subr.bf16.mxu0 %v3838_v16  ;;  %2359 = vmatprep.subr.bf16.mxu1 %v3841_v17  ;;  %v3917_v16 = vld [vmem:[#allocation8 + $0x644] ss:$16 sps:$4 sm:$0xff]   ;;  %v3920_v17 = vld [vmem:[#allocation8 + $0x64c] ss:$16 sps:$4 sm:$0xff]  }
 0x1bf   :  { %2188 = vmatpush1.bf16.msra.mxu0 %v3836_v18  ;;  %2360 = vmatpush1.bf16.msra.mxu1 %v3839_v19  ;;  %v3918_v18 = vld [vmem:[#allocation8 + $0x648] ss:$16 sps:$4 sm:$0xff]   ;;  %v3923_v19 = vld [vmem:[#allocation8 + $0x664] ss:$16 sps:$4 sm:$0xff]  }
 0x1c0   :  { %2189 = vmatprep.subr.bf16.mxu0 %v3844_v20  ;;  %2361 = vmatprep.subr.bf16.mxu1 %v3847_v21  ;;  %v3926_v20 = vld [vmem:[#allocation8 + $0x66c] ss:$16 sps:$4 sm:$0xff]   ;;  %v3921_v21 = vld [vmem:[#allocation8 + $0x660] ss:$16 sps:$4 sm:$0xff]  }
 0x1c3   :  { %2190 = vmatpush1.bf16.msra.mxu0 %v3842_v22  ;;  %2362 = vmatpush1.bf16.msra.mxu1 %v3845_v23  ;;  %v3924_v22 = vld [vmem:[#allocation8 + $0x668] ss:$16 sps:$4 sm:$0xff]   ;;  %v3929_v23 = vld [vmem:[#allocation8 + $0x684] ss:$16 sps:$4 sm:$0xff]  }
 0x1c4   :  { %2191 = vmatprep.subr.bf16.mxu0 %v3850_v25  ;;  %2363 = vmatprep.subr.bf16.mxu1 %v3853_v28  ;;  %v3932_v25 = vld [vmem:[#allocation8 + $0x68c] ss:$16 sps:$4 sm:$0xff]   ;;  %v3927_v28 = vld [vmem:[#allocation8 + $0x680] ss:$16 sps:$4 sm:$0xff]  }
 0x1c7   :  { %2192 = vmatpush1.bf16.msra.mxu0 %v3848_v29  ;;  %2364 = vmatpush1.bf16.msra.mxu1 %v3851_v30  ;;  %v3930_v29 = vld [vmem:[#allocation8 + $0x688] ss:$16 sps:$4 sm:$0xff]   ;;  %v3935_v30 = vld [vmem:[#allocation8 + $0x6a4] ss:$16 sps:$4 sm:$0xff]  }
 0x1c8   :  { %2193 = vmatprep.subr.bf16.mxu0 %v3856_v32  ;;  %2365 = vmatprep.subr.bf16.mxu1 %v3859_v33  ;;  %v3938_v32 = vld [vmem:[#allocation8 + $0x6ac] ss:$16 sps:$4 sm:$0xff]   ;;  %v3933_v33 = vld [vmem:[#allocation8 + $0x6a0] ss:$16 sps:$4 sm:$0xff]  }
 0x1cb   :  { %2194 = vmatpush1.bf16.msra.mxu0 %v3854_v52  ;;  %2366 = vmatpush1.bf16.msra.mxu1 %v3857_v34  ;;  %v3936_v52 = vld [vmem:[#allocation8 + $0x6a8] ss:$16 sps:$4 sm:$0xff]   ;;  %v3941_v34 = vld [vmem:[#allocation8 + $0x6c4] ss:$16 sps:$4 sm:$0xff]  }
 0x1cc   :  { %2195 = vmatprep.subr.bf16.mxu0 %v3862_v35  ;;  %2367 = vmatprep.subr.bf16.mxu1 %v3865_v36  ;;  %v3944_v35 = vld [vmem:[#allocation8 + $0x6cc] ss:$16 sps:$4 sm:$0xff]   ;;  %v3939_v36 = vld [vmem:[#allocation8 + $0x6c0] ss:$16 sps:$4 sm:$0xff]  }
 0x1cf   :  { %2196 = vmatpush1.bf16.msra.mxu0 %v3860_v37  ;;  %2368 = vmatpush1.bf16.msra.mxu1 %v3863_v38  ;;  %v3942_v37 = vld [vmem:[#allocation8 + $0x6c8] ss:$16 sps:$4 sm:$0xff]   ;;  %v3947_v38 = vld [vmem:[#allocation8 + $0x6e4] ss:$16 sps:$4 sm:$0xff]  }
 0x1d0   :  { %2197 = vmatprep.subr.bf16.mxu0 %v3868_v45  ;;  %2369 = vmatprep.subr.bf16.mxu1 %v3871_v39  ;;  %v3950_v45 = vld [vmem:[#allocation8 + $0x6ec] ss:$16 sps:$4 sm:$0xff]   ;;  %v3945_v39 = vld [vmem:[#allocation8 + $0x6e0] ss:$16 sps:$4 sm:$0xff]  }
 0x1d3   :  { %2198 = vmatpush1.bf16.msra.mxu0 %v3866_v40  ;;  %2370 = vmatpush1.bf16.msra.mxu1 %v3869_v42  ;;  %v3948_v40 = vld [vmem:[#allocation8 + $0x6e8] ss:$16 sps:$4 sm:$0xff]   ;;  %v3953_v42 = vld [vmem:[#allocation8 + $0x704] ss:$16 sps:$4 sm:$0xff]  }
 0x1d4   :  { %2199 = vmatprep.subr.bf16.mxu0 %v3874_v43  ;;  %2371 = vmatprep.subr.bf16.mxu1 %v3877_v44  ;;  %v3956_v43 = vld [vmem:[#allocation8 + $0x70c] ss:$16 sps:$4 sm:$0xff]   ;;  %v3951_v44 = vld [vmem:[#allocation8 + $0x700] ss:$16 sps:$4 sm:$0xff]  }
 0x1d7   :  { %2200 = vmatpush1.bf16.msra.mxu0 %v3872_v46  ;;  %2372 = vmatpush1.bf16.msra.mxu1 %v3875_v48  ;;  %v3954_v46 = vld [vmem:[#allocation8 + $0x708] ss:$16 sps:$4 sm:$0xff]   ;;  %v3959_v48 = vld [vmem:[#allocation8 + $0x724] ss:$16 sps:$4 sm:$0xff]  }
 0x1d8   :  { %2201 = vmatprep.subr.bf16.mxu0 %v3880_v49  ;;  %2373 = vmatprep.subr.bf16.mxu1 %v3883_v51  ;;  %v3962_v49 = vld [vmem:[#allocation8 + $0x72c] ss:$16 sps:$4 sm:$0xff]   ;;  %v3957_v51 = vld [vmem:[#allocation8 + $0x720] ss:$16 sps:$4 sm:$0xff]  }
 0x1db   :  { %2202 = vmatpush1.bf16.msra.mxu0 %v3878_v54  ;;  %2374 = vmatpush1.bf16.msra.mxu1 %v3881_v55  ;;  %v3965_v54 = vld [vmem:[#allocation8 + $0x744] ss:$16 sps:$4 sm:$0xff]   ;;  %v3968_v55 = vld [vmem:[#allocation8 + $0x74c] ss:$16 sps:$4 sm:$0xff]  }
 0x1dc   :  { %2203 = vmatprep.subr.bf16.mxu0 %v3887_v58  ;;  %2375 = vmatprep.subr.bf16.mxu1 %v3890_v59  ;;  %v3963_v58 = vld [vmem:[#allocation8 + $0x740] ss:$16 sps:$4 sm:$0xff]   ;;  %v3966_v59 = vld [vmem:[#allocation8 + $0x748] ss:$16 sps:$4 sm:$0xff]  }
 0x1df   :  { %2204 = vmatpush1.bf16.msra.mxu0 %v3885_v60  ;;  %2376 = vmatpush1.bf16.msra.mxu1 %v3888_v1  ;;  %v3974_v60 = vld [vmem:[#allocation8 + $0x76c] ss:$16 sps:$4 sm:$0xff]   ;;  %v3969_v1 = vld [vmem:[#allocation8 + $0x760] ss:$16 sps:$4 sm:$0xff]  }
 0x1e0   :  { %2205 = vmatprep.subr.bf16.mxu0 %v3893_v4  ;;  %2377 = vmatprep.subr.bf16.mxu1 %v3896_v57  ;;  %v3972_v4 = vld [vmem:[#allocation8 + $0x768] ss:$16 sps:$4 sm:$0xff]   ;;  %v3977_v57 = vld [vmem:[#allocation8 + $0x784] ss:$16 sps:$4 sm:$0xff]  }
 0x1e3   :  { %2206 = vmatpush1.bf16.msra.mxu0 %v3891_v31  ;;  %2378 = vmatpush1.bf16.msra.mxu1 %v3894_v24  ;;  %v3975_v31 = vld [vmem:[#allocation8 + $0x780] ss:$16 sps:$4 sm:$0xff]   ;;  %v3978_v24 = vld [vmem:[#allocation8 + $0x788] ss:$16 sps:$4 sm:$0xff]  }
 0x1e4   :  { %2207 = vmatprep.subr.bf16.mxu0 %v3899_v26  ;;  %2379 = vmatprep.subr.bf16.mxu1 %v3902_v0  ;;  %v3983_v26 = vld [vmem:[#allocation8 + $0x7a4] ss:$16 sps:$4 sm:$0xff]   ;;  %v3986_v0 = vld [vmem:[#allocation8 + $0x7ac] ss:$16 sps:$4 sm:$0xff]  }
 0x1e7   :  { %2208 = vmatpush1.bf16.msra.mxu0 %v3897_v3  ;;  %2380 = vmatpush1.bf16.msra.mxu1 %v3900_v5  ;;  %v3984_v3 = vld [vmem:[#allocation8 + $0x7a8] ss:$16 sps:$4 sm:$0xff]   ;;  %v3989_v5 = vld [vmem:[#allocation8 + $0x7c4] ss:$16 sps:$4 sm:$0xff]  }
 0x1e8   :  { %2220 = vmatprep.subr.bf16.mxu0 %v3905_v7  ;;  %2392 = vmatprep.subr.bf16.mxu1 %v3908_v8  ;;  %v3987_v7 = vld [vmem:[#allocation8 + $0x7c0] ss:$16 sps:$4 sm:$0xff]   ;;  %v3990_v8 = vld [vmem:[#allocation8 + $0x7c8] ss:$16 sps:$4 sm:$0xff]  }
 0x1ea   :  { %2210 = vmatmul.mubr.bf16.vlgmr.msra.gmra.mrb[8].mxu0 %v551_v12  ;;  %2382 = vmatmul.mubr.bf16.vlgmr.msra.gmra.mrb[8].mxu1 %v551_v12  ;;  %v3996_v12 = vld [vmem:[#allocation8 + $0x7e8] ss:$16 sps:$4 sm:$0xff]  }
 0x1eb   :  { %2221 = vmatpush1.bf16.msra.mxu0 %v3903_v10  ;;  %2393 = vmatpush1.bf16.msra.mxu1 %v3906_v11  ;;  %v3998_v10 = vld [vmem:[#allocation8 + $0x7ec] ss:$16 sps:$4 sm:$0xff]   ;;  %v3993_v11 = vld [vmem:[#allocation8 + $0x7e0] ss:$16 sps:$4 sm:$0xff]  }
 0x1ec   :  { %2222 = vmatprep.subr.bf16.mxu0 %v3911_v47  ;;  %2394 = vmatprep.subr.bf16.mxu1 %v3914_v56  ;;  %v545_v47 = vmul.bf16 1045249613, %v4491_v63  ;;  %v3999_v56 = vld [vmem:[#allocation10 + $0x40] sm:$0xff]  }
 0x1ed   :  { %2252 = vmatprep.mubr.bf16.mxu0 %v554_v62  ;;  %2424 = vmatprep.mubr.bf16.mxu1 %v554_v62  ;;  %v4000_v62 = vld [vmem:[#allocation10 + $0xc0] sm:$0xff]  }
 0x1ef   :  { %2223 = vmatpush1.bf16.msra.mxu0 %v3909_v13  ;;  %2395 = vmatpush1.bf16.msra.mxu1 %v3912_v15  ;;  %v4001_v13 = vld [vmem:[#allocation10] sm:$0xff]  }
 0x1f0   :  { %2224 = vmatprep.subr.bf16.mxu0 %v3917_v16  ;;  %2396 = vmatprep.subr.bf16.mxu1 %v3920_v17  ;;  %v4002_v15 = vld [vmem:[#allocation10 + $0x80] sm:$0xff]   ;;  %v553_v16 = vmax.bf16 %v545_v47, %v4491_v63  ;;  %v4003_v17 = vld [vmem:[#allocation10 + $0x48] sm:$0xff]   ;;  %v4011_v63 = vld [vmem:[#allocation10 + $0x58] sm:$0xff]  }
 0x1f3   :  { %2225 = vmatpush1.bf16.msra.mxu0 %v3915_v27  ;;  %2397 = vmatpush1.bf16.msra.mxu1 %v3918_v18  ;;  %v4004_v27 = vld [vmem:[#allocation10 + $0xc8] sm:$0xff]  }
 0x1f4   :  { %2226 = vmatprep.subr.bf16.mxu0 %v3923_v19  ;;  %2398 = vmatprep.subr.bf16.mxu1 %v3926_v20  ;;  %v4005_v18 = vld [vmem:[#allocation10 + $0x8] sm:$0xff]   ;;  %v4007_v20 = vld [vmem:[#allocation10 + $0x50] sm:$0xff]  }
 0x1f5   :  { %v4006_v19 = vld [vmem:[#allocation10 + $0x88] sm:$0xff]  }
 0x1f7   :  { %2227 = vmatpush1.bf16.msra.mxu0 %v3921_v21  ;;  %2399 = vmatpush1.bf16.msra.mxu1 %v3924_v22  ;;  %v4008_v21 = vld [vmem:[#allocation10 + $0xd0] sm:$0xff]  }
 0x1f8   :  { %2228 = vmatprep.subr.bf16.mxu0 %v3929_v23  ;;  %2400 = vmatprep.subr.bf16.mxu1 %v3932_v25  ;;  %v4009_v22 = vld [vmem:[#allocation10 + $0x10] sm:$0xff]   ;;  %v4012_v25 = vld [vmem:[#allocation10 + $0xd8] sm:$0xff]  }
 0x1f9   :  { %v4010_v23 = vld [vmem:[#allocation10 + $0x90] sm:$0xff]  }
 0x1fb   :  { %2229 = vmatpush1.bf16.msra.mxu0 %v3927_v28  ;;  %2401 = vmatpush1.bf16.msra.mxu1 %v3930_v29  ;;  %v4013_v28 = vld [vmem:[#allocation10 + $0x18] sm:$0xff]  }
 0x1fc   :  { %2230 = vmatprep.subr.bf16.mxu0 %v3935_v30  ;;  %2402 = vmatprep.subr.bf16.mxu1 %v3938_v32  ;;  %v4014_v29 = vld [vmem:[#allocation10 + $0x98] sm:$0xff]   ;;  %v4015_v30 = vld [vmem:[#allocation10 + $0x60] sm:$0xff]  }
 0x1fd   :  { %v4016_v32 = vld [vmem:[#allocation10 + $0xe0] sm:$0xff]  }
 0x1ff   :  { %2231 = vmatpush1.bf16.msra.mxu0 %v3933_v33  ;;  %2403 = vmatpush1.bf16.msra.mxu1 %v3936_v52  ;;  %v4017_v33 = vld [vmem:[#allocation10 + $0x20] sm:$0xff]  }
 0x200   :  { %2232 = vmatprep.subr.bf16.mxu0 %v3941_v34  ;;  %2404 = vmatprep.subr.bf16.mxu1 %v3944_v35  ;;  %v4018_v52 = vld [vmem:[#allocation10 + $0xa0] sm:$0xff]   ;;  %v4019_v34 = vld [vmem:[#allocation10 + $0x68] sm:$0xff]  }
 0x201   :  { %v4020_v35 = vld [vmem:[#allocation10 + $0xe8] sm:$0xff]  }
 0x203   :  { %2233 = vmatpush1.bf16.msra.mxu0 %v3939_v36  ;;  %2405 = vmatpush1.bf16.msra.mxu1 %v3942_v37  ;;  %v4021_v36 = vld [vmem:[#allocation10 + $0x28] sm:$0xff]  }
 0x204   :  { %2234 = vmatprep.subr.bf16.mxu0 %v3947_v38  ;;  %2406 = vmatprep.subr.bf16.mxu1 %v3950_v45  ;;  %v4022_v37 = vld [vmem:[#allocation10 + $0xa8] sm:$0xff]   ;;  %v4023_v38 = vld [vmem:[#allocation10 + $0x70] sm:$0xff]  }
 0x205   :  { %v4024_v45 = vld [vmem:[#allocation10 + $0xf0] sm:$0xff]  }
 0x207   :  { %2235 = vmatpush1.bf16.msra.mxu0 %v3945_v39  ;;  %2407 = vmatpush1.bf16.msra.mxu1 %v3948_v40  ;;  %v4025_v39 = vld [vmem:[#allocation10 + $0x30] sm:$0xff]  }
 0x208   :  { %2236 = vmatprep.subr.bf16.mxu0 %v3953_v42  ;;  %2408 = vmatprep.subr.bf16.mxu1 %v3956_v43  ;;  %v4026_v40 = vld [vmem:[#allocation10 + $0xb0] sm:$0xff]   ;;  %v4027_v42 = vld [vmem:[#allocation10 + $0x78] sm:$0xff]  }
 0x209   :  { %v4028_v43 = vld [vmem:[#allocation10 + $0xf8] sm:$0xff]  }
 0x20b   :  { %2237 = vmatpush1.bf16.msra.mxu0 %v3951_v44  ;;  %2409 = vmatpush1.bf16.msra.mxu1 %v3954_v46  ;;  %v4029_v44 = vld [vmem:[#allocation10 + $0x38] sm:$0xff]  }
 0x20c   :  { %2238 = vmatprep.subr.bf16.mxu0 %v3959_v48  ;;  %2410 = vmatprep.subr.bf16.mxu1 %v3962_v49  ;;  %v4030_v46 = vld [vmem:[#allocation10 + $0xb8] sm:$0xff]   ;;  %v4253_v48 = vmov 0.0   ;;  %v3401_v49 = vld.sshfl [vmem:[%s4574_s5] sm:$0x33 pattern:$0x75316420] }
 0x20f   :  { %2239 = vmatpush1.bf16.msra.mxu0 %v3957_v51  ;;  %2411 = vmatpush1.bf16.msra.mxu1 %v3960_v53  ;;  %v2448_v51 = vcombine.high %v3401_v49, %v3401_v49  ;;  %v2455_v53 = vrot.slane %v3401_v49, %v4441_v41 }
 0x210   :  { %2240 = vmatprep.subr.bf16.mxu0 %v3965_v54  ;;  %2412 = vmatprep.subr.bf16.mxu1 %v3968_v55 }
 0x211   :  { %v2462_v54 = vrot.slane %v2448_v51, %v4441_v41  ;;  %v2463_v55 = vcombine.high %v2455_v53, %v2455_v53 }
 0x213   :  { %2241 = vmatpush1.bf16.msra.mxu0 %v3963_v58  ;;  %2413 = vmatpush1.bf16.msra.mxu1 %v3966_v59  ;;  %v2464_v58 = vcombine.high %v2462_v54, %v2462_v54  ;;  %v2466_v59 = vpack.i.b16 %v2455_v53, %v2455_v53 }
 0x214   :  { %2242 = vmatprep.subr.bf16.mxu0 %v3971_v61  ;;  %2414 = vmatprep.subr.bf16.mxu1 %v3974_v60  ;;  %v2480_v61 = vpack.i.b16 %v2463_v55, %v2463_v55  ;;  %v2473_v60 = vpack.i.b16 %v2462_v54, %v2462_v54 }
 0x217   :  { %2243 = vmatpush1.bf16.msra.mxu0 %v3969_v1  ;;  %2415 = vmatpush1.bf16.msra.mxu1 %v3972_v4  ;;  %v2487_v1 = vpack.i.b16 %v2464_v58, %v2464_v58 }
 0x218   :  { %2244 = vmatprep.subr.bf16.mxu0 %v3977_v57  ;;  %2416 = vmatprep.subr.bf16.mxu1 %v3980_v14 }
 0x219   :  { %v2492_v41 = vrot.slane %v2487_v1, %v4453_v50 }
 0x21b   :  { %2245 = vmatpush1.bf16.msra.mxu0 %v3975_v31  ;;  %2417 = vmatpush1.bf16.msra.mxu1 %v3978_v24  ;;  %v2471_v24 = vrot.slane %v2466_v59, %v4453_v50 }
 0x21c   :  { %2246 = vmatprep.subr.bf16.mxu0 %v3983_v26  ;;  %2418 = vmatprep.subr.bf16.mxu1 %v3986_v0  ;;  %v2485_v26 = vrot.slane %v2480_v61, %v4453_v50 }
 0x21f   :  { %2247 = vmatpush1.bf16.msra.mxu0 %v3981_v2  ;;  %2419 = vmatpush1.bf16.msra.mxu1 %v3984_v3  ;;  %v2478_v3 = vrot.slane %v2473_v60, %v4453_v50 }
 0x220   :  { %2248 = vmatprep.subr.bf16.mxu0 %v3989_v5  ;;  %2420 = vmatprep.subr.bf16.mxu1 %v3992_v6 }
 0x223   :  { %2249 = vmatpush1.bf16.msra.mxu0 %v3987_v7  ;;  %2421 = vmatpush1.bf16.msra.mxu1 %v3990_v8 }
 0x224   :  { %2250 = vmatprep.subr.bf16.mxu0 %v3995_v9  ;;  %2422 = vmatprep.subr.bf16.mxu1 %v3998_v10 }
 0x227   :  { %2251 = vmatpush1.bf16.msra.mxu0 %v3993_v11  ;;  %2423 = vmatpush1.bf16.msra.mxu1 %v3996_v12 }
 0x228   :  { %3461 = vmatprep.subr.bf16.mxu0 %v3999_v56  ;;  %3483 = vmatprep.subr.bf16.mxu1 %v4000_v62 }
 0x22a   :  { %2253 = vmatmul.mubr.bf16.vlgmr.msra.gmra.mrb[8].mxu0 %v553_v16  ;;  %2425 = vmatmul.mubr.bf16.vlgmr.msra.gmra.mrb[8].mxu1 %v553_v16 }
 0x22b   :  { %3462 = vmatpush3.bf16.msra.mxu0 %v4001_v13  ;;  %3484 = vmatpush3.bf16.msra.mxu1 %v4002_v15 }
 0x22c   :  { %3463 = vmatprep.subr.bf16.mxu0 %v4003_v17  ;;  %3485 = vmatprep.subr.bf16.mxu1 %v4004_v27 }
 0x22f   :  { %3464 = vmatpush3.bf16.msra.mxu0 %v4005_v18  ;;  %3486 = vmatpush3.bf16.msra.mxu1 %v4006_v19  ;;  %v4031_v18 = vld [vmem:[#allocation13] sm:$0xff]  }
 0x230   :  { %3465 = vmatprep.subr.bf16.mxu0 %v4007_v20  ;;  %3487 = vmatprep.subr.bf16.mxu1 %v4008_v21  ;;  %v4032_v19 = vld [vmem:[#allocation11] sm:$0xff]  }
 0x233   :  { %3466 = vmatpush3.bf16.msra.mxu0 %v4009_v22  ;;  %3488 = vmatpush3.bf16.msra.mxu1 %v4010_v23  ;;  %v4033_v22 = vld [vmem:[#allocation13 + $0x8] sm:$0xff]  }
 0x234   :  { %3467 = vmatprep.subr.bf16.mxu0 %v4011_v63  ;;  %3489 = vmatprep.subr.bf16.mxu1 %v4012_v25  ;;  %v4034_v23 = vld [vmem:[#allocation11 + $0x8] sm:$0xff]   ;;  %v4035_v63 = vld [vmem:[#allocation13 + $0x10] sm:$0xff]  }
 0x235   :  { %v4036_v25 = vld [vmem:[#allocation11 + $0x10] sm:$0xff]  }
 0x237   :  { %3468 = vmatpush3.bf16.msra.mxu0 %v4013_v28  ;;  %3490 = vmatpush3.bf16.msra.mxu1 %v4014_v29  ;;  %v4037_v28 = vld [vmem:[#allocation13 + $0x18] sm:$0xff]  }
 0x238   :  { %3469 = vmatprep.subr.bf16.mxu0 %v4015_v30  ;;  %3491 = vmatprep.subr.bf16.mxu1 %v4016_v32  ;;  %v4038_v29 = vld [vmem:[#allocation11 + $0x18] sm:$0xff]   ;;  %v4039_v30 = vld [vmem:[#allocation13 + $0x20] sm:$0xff]  }
 0x239   :  { %v4040_v32 = vld [vmem:[#allocation11 + $0x20] sm:$0xff]  }
 0x23b   :  { %3470 = vmatpush3.bf16.msra.mxu0 %v4017_v33  ;;  %3492 = vmatpush3.bf16.msra.mxu1 %v4018_v52  ;;  %v4041_v33 = vld [vmem:[#allocation13 + $0x28] sm:$0xff]  }
 0x23c   :  { %3471 = vmatprep.subr.bf16.mxu0 %v4019_v34  ;;  %3493 = vmatprep.subr.bf16.mxu1 %v4020_v35  ;;  %v4042_v52 = vld [vmem:[#allocation11 + $0x28] sm:$0xff]   ;;  %v4043_v34 = vld [vmem:[#allocation13 + $0x30] sm:$0xff]  }
 0x23d   :  { %v4044_v35 = vld [vmem:[#allocation11 + $0x30] sm:$0xff]  }
 0x23f   :  { %3472 = vmatpush3.bf16.msra.mxu0 %v4021_v36  ;;  %3494 = vmatpush3.bf16.msra.mxu1 %v4022_v37  ;;  %v4045_v36 = vld [vmem:[#allocation13 + $0x38] sm:$0xff]  }
 0x240   :  { %3473 = vmatprep.subr.bf16.mxu0 %v4023_v38  ;;  %3495 = vmatprep.subr.bf16.mxu1 %v4024_v45  ;;  %v4046_v37 = vld [vmem:[#allocation5] sm:$0xff]   ;;  %v2844_v45 = vld [vmem:[%s4576_s7] sm:$0x1] }
 0x241   :  { %v4047_v38 = vld [vmem:[#allocation11 + $0x38] sm:$0xff]   ;;  %v2846_v53 = vpack.i.b16 %v2844_v45, %v2844_v45 }
 0x243   :  { %3474 = vmatpush3.bf16.msra.mxu0 %v4025_v39  ;;  %3496 = vmatpush3.bf16.msra.mxu1 %v4026_v40  ;;  %v2851_v60 = vrot.slane %v2846_v53, %v4453_v50 }
 0x244   :  { %3475 = vmatprep.subr.bf16.mxu0 %v4027_v42  ;;  %3497 = vmatprep.subr.bf16.mxu1 %v4028_v43 }
 0x247   :  { %3476 = vmatpush3.bf16.msra.mxu0 %v4029_v44  ;;  %3498 = vmatpush3.bf16.msra.mxu1 %v4030_v46 }
 0x248   :  { %3523 = vmatprep.subr.bf16.mxu0 %v4253_v48  ;;  %3543 = vmatprep.subr.bf16.mxu1 %v4253_v48 }
 0x2fd   :  { %v2254_v4 = vpop.f32.mrb[8].mxu0  ;;  %v2426_v57 = vpop.f32.mrb[8].mxu1 }
 0x2fe   :  { %v2256_v14 = vpop.f32.mrb[9].mxu0  ;;  %v2428_v31 = vpop.f32.mrb[9].mxu1 }
 0x2ff   :  { %v2258_v0 = vpop.f32.mrb[10].mxu0  ;;  %v2430_v2 = vpop.f32.mrb[10].mxu1 }
 0x300   :  { %v2435_v5 = vpack.c.bf16 %v2258_v0, %v2254_v4  ;;  %v2437_v6 = vpack.c.bf16 %v2430_v2, %v2426_v57  ;;  %v2260_v7 = vpop.f32.mrb[11].mxu0  ;;  %v2432_v8 = vpop.f32.mrb[11].mxu1 }
 0x301   :  { %v2436_v9 = vpack.c.bf16 %v2260_v7, %v2256_v14  ;;  %v2438_v10 = vpack.c.bf16 %v2432_v8, %v2428_v31 }
 0x302   :  { %v2493_v11 = vadd.bf16 %v2471_v24, %v2435_v5  ;;  %v2495_v12 = vadd.bf16 %v2485_v26, %v2437_v6 }
 0x303   :  { %v2494_v47 = vadd.bf16 %v2478_v3, %v2436_v9  ;;  %v2496_v56 = vadd.bf16 %v2492_v41, %v2438_v10  ;;  %v3451_v3 = vld [vmem:[%s4579_s10] ss:$0 sm:$0xff]  ;;  %s4206_s10 = scalar_lea.vmem %s3106_s27, 128 }
 0x304   :  { %v2497_v62 = vmul.bf16 1045249613, %v2493_v11  ;;  %v2499_v13 = vmul.bf16 1045249613, %v2495_v12  ;;  %p4207_p0 = scmp.ne.s32.totalorder %s3106_s27, %s4206_s10  ;;  %p4212_p2 = scmp.lt.s32.totalorder %s4206_s10, %s4206_s10 }
 0x305   :  { %v2498_v15 = vmul.bf16 1045249613, %v2494_v47  ;;  %v2500_v16 = vmul.bf16 1045249613, %v2496_v56 }
 0x306   :  { %v2501_v20 = vmax.bf16 %v2497_v62, %v2493_v11  ;;  %v2503_v21 = vmax.bf16 %v2499_v13, %v2495_v12  ;;  %p4213_p3 = por %p4212_p2, %p4211_p1 }
 0x307   :  { %v2502_v17 = vmax.bf16 %v2498_v15, %v2494_v47  ;;  %v2504_v27 = vmax.bf16 %v2500_v16, %v2496_v56 }
 0x308   :  { %p4214_p4 = pnand %p4213_p3, %p4207_p0 }
 0x309   :  { %2793 = vmatprep.mubr.bf16.mxu0 %v2502_v17  ;;  %2834 = vmatprep.mubr.bf16.mxu1 %v2504_v27 }
 0x30a   :  { %2794 = vmatmul.mubr.bf16.vlgmr.msra.gmra.mrb[12].mxu0 %v2501_v20  ;;  %2835 = vmatmul.mubr.bf16.vlgmr.msra.gmra.mrb[12].mxu1 %v2503_v21 }
 0x30b   :  { %3524 = vmatpush3.bf16.msra.mxu0 %v4031_v18  ;;  %3544 = vmatpush3.bf16.msra.mxu1 %v4032_v19 }
 0x30c   :  { %3525 = vmatprep.subr.bf16.mxu0 %v4253_v48  ;;  %3545 = vmatprep.subr.bf16.mxu1 %v4253_v48 }
 0x30d   :  { %3539 = vmatprep.mubr.msk.bf16.mxu0 %vm4254_vm2, %v4253_v48  ;;  %3559 = vmatprep.mubr.msk.bf16.mxu1 %vm4254_vm2, %v4253_v48 }
 0x30f   :  { %3526 = vmatpush3.bf16.msra.mxu0 %v4033_v22  ;;  %3546 = vmatpush3.bf16.msra.mxu1 %v4034_v23 }
 0x310   :  { %3527 = vmatprep.subr.bf16.mxu0 %v4253_v48  ;;  %3547 = vmatprep.subr.bf16.mxu1 %v4253_v48 }
 0x313   :  { %3528 = vmatpush3.bf16.msra.mxu0 %v4035_v63  ;;  %3548 = vmatpush3.bf16.msra.mxu1 %v4036_v25 }
 0x314   :  { %3529 = vmatprep.subr.bf16.mxu0 %v4253_v48  ;;  %3549 = vmatprep.subr.bf16.mxu1 %v4253_v48 }
 0x317   :  { %3530 = vmatpush3.bf16.msra.mxu0 %v4037_v28  ;;  %3550 = vmatpush3.bf16.msra.mxu1 %v4038_v29 }
 0x318   :  { %3531 = vmatprep.subr.bf16.mxu0 %v4253_v48  ;;  %3551 = vmatprep.subr.bf16.mxu1 %v4253_v48 }
 0x31b   :  { %3532 = vmatpush3.bf16.msra.mxu0 %v4039_v30  ;;  %3552 = vmatpush3.bf16.msra.mxu1 %v4040_v32 }
 0x31c   :  { %3533 = vmatprep.subr.bf16.mxu0 %v4253_v48  ;;  %3553 = vmatprep.subr.bf16.mxu1 %v4253_v48 }
 0x31f   :  { %3534 = vmatpush3.bf16.msra.mxu0 %v4041_v33  ;;  %3554 = vmatpush3.bf16.msra.mxu1 %v4042_v52 }
 0x320   :  { %3535 = vmatprep.subr.bf16.mxu0 %v4253_v48  ;;  %3555 = vmatprep.subr.bf16.mxu1 %v4253_v48 }
 0x323   :  { %3536 = vmatpush3.bf16.msra.mxu0 %v4043_v34  ;;  %3556 = vmatpush3.bf16.msra.mxu1 %v4044_v35 }
 0x324   :  { %3537 = vmatprep.subr.bf16.mxu0 %v4253_v48  ;;  %3557 = vmatprep.subr.bf16.mxu1 %v4253_v48 }
 0x327   :  { %3538 = vmatpush3.bf16.msra.mxu0 %v4045_v36  ;;  %3558 = vmatpush3.bf16.msra.mxu1 %v4047_v38 }
 0x32a   :  { %3540 = vmatmul.mubr.bf16.vlgmr.msra.gmra.mrb[16].mxu0 %v4046_v37 }
 0x3dd   :  { %v3477_v39 = vpop.f32.mrb[12].mxu0  ;;  %v3499_v40 = vpop.f32.mrb[12].mxu1 }
 0x3de   :  { %v3478_v42 = vpop.f32.mrb[13].mxu0  ;;  %v3500_v43 = vpop.f32.mrb[13].mxu1 }
 0x3df   :  { %v3479_v44 = vadd.f32 %v3478_v42, %v3477_v39  ;;  %v3501_v46 = vadd.f32 %v3500_v43, %v3499_v40  ;;  %v3480_v49 = vpop.f32.mrb[14].mxu0  ;;  %v3502_v51 = vpop.f32.mrb[14].mxu1 }
 0x3e0   :  { %v3481_v54 = vpop.f32.mrb[15].mxu0  ;;  %v3503_v55 = vpop.f32.mrb[15].mxu1 }
 0x3e1   :  { %v2837_v58 = vadd.f32 %v3501_v46, %v3479_v44  ;;  %v3482_v59 = vadd.f32 %v3481_v54, %v3480_v49  ;;  %v3504_v48 = vadd.f32 %v3503_v55, %v3502_v51 }
 0x3e3   :  { %v2840_v61 = vadd.f32 %v3504_v48, %v3482_v59 }
 0x3e5   :  { %v2843_v1 = vpack.c.bf16 %v2840_v61, %v2837_v58 }
 0x3e7   :  { %v2852_v4 = vadd.bf16 %v2851_v60, %v2843_v1 }
 0x3e9   :  { %v2853_v57 = vmul.bf16 1045249613, %v2852_v4 }
 0x3eb   :  { %v2854_v14 = vmax.bf16 %v2853_v57, %v2852_v4 }
 0x3ed   :  { %3560 = vmatmul.mubr.bf16.vlgmr.msra.gmra.mrb[16].mxu1 %v2854_v14 }
 0x3fd   :  { %v2977_v31 = vpop.f32.mrb[16].mxu0 }
 0x3fe   :  { %v3541_v24 = vpop.f32.mrb[17].mxu0 }
 0x3ff   :  { %v2980_v26 = vpop.f32.mrb[18].mxu0 }
 0x400   :  { %v3542_v0 = vpop.f32.mrb[19].mxu0 }
 0x4c0   :  { %v3066_v2 = vpop.f32.mrb[16].mxu1 }
 0x4c1   :  { %v3067_v41 = vadd.f32 %v3066_v2, %v2977_v31  ;;  %v3561_v5 = vpop.f32.mrb[17].mxu1 }
 0x4c2   :  { %v3069_v6 = vpop.f32.mrb[18].mxu1 }
 0x4c3   :  { %v3080_v7 = vadd.f32 %v3451_v3, %v3067_v41  ;;  %v3070_v8 = vadd.f32 %v3069_v6, %v2980_v26  ;;  %v3562_v50 = vpop.f32.mrb[19].mxu1 }
 0x4c5   :  { %v3082_v9 = vmul.f32 0.5, %v3080_v7  ;;  %v3081_v10 = vadd.f32 %v3451_v3, %v3070_v8 }
 0x4c7   :  { %4048 = vtanh.f32 %v3082_v9  ;;  %v3083_v11 = vmul.f32 0.5, %v3081_v10 }
 0x4c9   :  { %4050 = vtanh.f32 %v3083_v11 }
 0x4d1   :  { %v4049_v12 = vpop.eup %4048 }
 0x4d2   :  { %v3086_v47 = vmul.f32 0.5, %v4049_v12 }
 0x4d3   :  { %v4051_v56 = vpop.eup %4050 }
 0x4d4   :  { %v3087_v62 = vmul.f32 0.5, %v4051_v56  ;;  %v3088_v13 = vadd.f32 0.5, %v3086_v47 }
 0x4d6   :  { %v3089_v15 = vadd.f32 0.5, %v3087_v62 }
 0x4d8   :  { %v3459_v16 = vpack.c.bf16 %v3089_v15, %v3088_v13 }
 0x4da   :  { %3460 = vst [vmem:[#allocation14] sm:$0xff] %v3459_v16  }
 0x4db   :  { %4217 = shalt.err (!%p4214_p4)
}
 0x4dc   :  { %s4218_s17 = scalar_lea.hbm %s4580_s11, 128 }
 0x4dd   :  { %p4219_p5 = scmp.ne.s32.totalorder %s4580_s11, %s4218_s17  ;;  %p4222_p6 = scmp.lt.u32.totalorder %s4218_s17, %s4580_s11 }
 0x4df   :  { %p4224_p7 = pnand %p4222_p6, %p4219_p5 }
 0x4e1   :  { %4227 = shalt.err (!%p4224_p7)
}
 0x4e2   :  { %3111 = dma.vmem_to_hbm [thread:$0]  %s3106_s27, 128, %s4580_s11, [#allocation4], %s4240_s29, %s4240_s29, %s4241_s30  }
 0x4e3   :  { %4236 = dma.done.wait [#allocation4], 128  }
 0x4e4   :  { %4237 = vsyncadd [#allocation4], 4294967168 }
 0x4e5   :  { %3115 = vsyncpa [#allocation3], 1 }
 0x4e6   :  { %3116 = vsyncpa [#allocation6], 1 }
 0x4e7   :  { %3117 = vsyncpa [#allocation9], 1 }
 0x4e8   :  { %3118 = vsyncpa [#allocation12], 1 }
 0x4e9   :  { %3119 = vsyncpa [#allocation4], 1 }

</bundles_post_ra>
